<compile_context>
chip_gen: v7x
topology: tpu7x:2x2x1
jax: 0.10.0
libtpu: 0.0.40
codegen_flags: <defaults>
</compile_context>

<pallas_src>
import numpy as np
import jax
import jax.numpy as jnp
from jax import lax
from jax.experimental import pallas as pl
from jax.experimental.pallas import tpu as pltpu

# ----------------------------------------------------------------------------
# Scaled-down analogs of the PyTorch module's hard-coded sizes
#   original: input_size=1024, output_size=batch_size=1280, conv out_channels=64,
#             fc hidden=1024, fc_in = 64 * (1280 // 2)
# ----------------------------------------------------------------------------
C_IN = 32            # Conv1d in_channels            (original 1024)
OUT_SIZE = 1024      # output_size == padded batch == sequence length L (orig 1280)
L = OUT_SIZE
C_OUT = 16           # Conv1d out_channels           (original 64)
LP = L // 2          # length after MaxPool1d(2)
HID = 128            # fc hidden size                (original 1024)
FC_IN = C_OUT * LP   # flattened feature size        (original 32 * 1280)
KS = 3               # conv kernel size
TLP = 256            # pooled-length tile processed per grid step


def residue_cnn_kernel(x_eo_ref, w2_ref, bc_ref, wfc_ref, bfc_ref,
                       wfc2t_ref, bfc2_ref, out_ref, acc_ref):
    i = pl.program_id(0)

    @pl.when(i == 0)
    def _():
        acc_ref[...] = jnp.zeros_like(acc_ref)

    # Conv1d for this tile's [even | odd] output columns as a single MXU matmul.
    r = jnp.dot(w2_ref[...], x_eo_ref[...],
                preferred_element_type=jnp.float32) + bc_ref[...]   # (C_OUT, 2*TLP) f32
    # ReLU + MaxPool1d(2):  relu(max(even, odd)) == max(relu(even), relu(odd)).
    pooled = jnp.maximum(jnp.maximum(r[:, :TLP], r[:, TLP:]), 0.0)  # (C_OUT, TLP) f32

    # Streamed FC1 partial product.  The wfc tile rows are ordered c*TLP + t,
    # which matches the row-major flatten of `pooled` (channel-major overall).
    pf = pooled.reshape(1, C_OUT * TLP).astype(jnp.bfloat16)
    acc_ref[...] += jnp.dot(pf, wfc_ref[0], preferred_element_type=jnp.float32)

    # Last tile: finish FC1 (bias + ReLU) and run FC2.
    @pl.when(i == pl.num_programs(0) - 1)
    def _():
        h = jnp.maximum(acc_ref[...] + bfc_ref[...], 0.0)            # (1, HID) f32
        out_ref[...] = jnp.dot(h.astype(jnp.bfloat16), wfc2t_ref[...],
                               preferred_element_type=jnp.float32) + bfc2_ref[...]


def residue_cnn_forward(x, params):
    """x: (B, C_IN) float32 with B <= OUT_SIZE.  Returns (B,) like the module."""
    assert L % 2 == 0 and LP % TLP == 0, "tile sizes must divide evenly"
    B = x.shape[0]
    n_t = LP // TLP

    # --- glue (layout only, no FLOPs): pad batch, transpose, mini im2col ------
    # Cast to bf16 first so all subsequent layout copies move half the bytes.
    xpad = jnp.zeros((L, C_IN), jnp.bfloat16).at[:B].set(x.astype(jnp.bfloat16))
    x_t = xpad.T                                                     # (C_IN, L)
    xp = jnp.pad(x_t, ((0, 0), (1, 1)))                              # conv zero pad=1
    # im2col rows: block k (k = 0, 1, 2) holds the input shifted by k.
    x2 = jnp.concatenate([xp[:, 0:L], xp[:, 1:L + 1], xp[:, 2:L + 2]], axis=0)
    # Fused conv RHS layout: for tile i, columns [i*2T, i*2T+T) are the even
    # conv columns of that tile, the next T columns are the odd ones.
    x2e = x2[:, 0::2].reshape(KS * C_IN, n_t, TLP)
    x2o = x2[:, 1::2].reshape(KS * C_IN, n_t, TLP)
    x_eo = jnp.concatenate([x2e, x2o], axis=2).reshape(KS * C_IN, 2 * LP)
    # TODO(synk): at original sizes, build the 3-shift im2col inside the kernel
    # from a single (C_IN, L+2) array to avoid the ~3x input copy in glue
    # (still <10% of the streamed FC1-weight bytes, so left to XLA here).

    # Conv weight as an im2col matrix: w2[co, k*C_IN + ci] = w_conv[co, ci, k].
    w2 = jnp.transpose(params["w_conv"], (0, 2, 1)).reshape(C_OUT, KS * C_IN)
    w2 = w2.astype(jnp.bfloat16)
    bc = params["b_conv"].reshape(C_OUT, 1).astype(jnp.float32)

    # FC1 weight, streamed one tile per grid step.  The original row order is
    # the channel-major flatten index c*LP + l; re-tile so tile i holds rows
    # ordered c*TLP + t  <->  flat index c*LP + i*TLP + t.
    wfc_t = params["w_fc"].T.reshape(C_OUT, n_t, TLP, HID)
    wfc_tiles = jnp.transpose(wfc_t, (1, 0, 2, 3)).reshape(n_t, C_OUT * TLP, HID)
    wfc_tiles = wfc_tiles.astype(jnp.bfloat16)
    bfc = params["b_fc"].reshape(1, HID).astype(jnp.float32)

    wfc2t = params["w_fc2"].T.astype(jnp.bfloat16)                   # (HID, OUT_SIZE)
    bfc2 = params["b_fc2"].reshape(1, OUT_SIZE).astype(jnp.float32)

    full = lambda shape: pl.BlockSpec(shape, lambda i: (0,) * len(shape))

    out = pl.pallas_call(
        residue_cnn_kernel,
        out_shape=jax.ShapeDtypeStruct((1, OUT_SIZE), jnp.float32),
        grid=(n_t,),
        in_specs=[
            pl.BlockSpec((KS * C_IN, 2 * TLP), lambda i: (0, i)),       # conv RHS tile
            full((C_OUT, KS * C_IN)),                                   # conv weight
            full((C_OUT, 1)),                                           # conv bias
            pl.BlockSpec((1, C_OUT * TLP, HID), lambda i: (i, 0, 0)),   # fc1 weight tile
            full((1, HID)),                                             # fc1 bias
            full((HID, OUT_SIZE)),                                      # fc2 weight^T
            full((1, OUT_SIZE)),                                        # fc2 bias
        ],
        out_specs=pl.BlockSpec((1, OUT_SIZE), lambda i: (0, 0)),
        scratch_shapes=[pltpu.VMEM((1, HID), jnp.float32)],             # FC1 accumulator
        compiler_params=pltpu.CompilerParams(dimension_semantics=("arbitrary",)),
    )(x_eo, w2, bc, wfc_tiles, bfc, wfc2t, bfc2)

    out = out.reshape(-1)          # view(-1)
    return out[:B]                 # slice back to the real batch size


def ref_forward(x, params):
    """Pure-JAX f32 reference matching the PyTorch forward semantics."""
    B = x.shape[0]
    xpad = jnp.zeros((L, C_IN), jnp.float32).at[:B].set(x)
    xc = xpad.T[None]                                                # (1, C_IN, L)
    conv = lax.conv_general_dilated(
        xc, params["w_conv"], window_strides=(1,), padding=((1, 1),),
        dimension_numbers=("NCH", "OIH", "NCH"))
    conv = conv + params["b_conv"][None, :, None]
    conv = jnp.maximum(conv, 0.0)
    pooled = jnp.max(conv.reshape(1, C_OUT, LP, 2), axis=-1)
    flat = pooled.reshape(1, -1)
    h = jnp.maximum(flat @ params["w_fc"].T + params["b_fc"], 0.0)
    o = h @ params["w_fc2"].T + params["b_fc2"]
    return o.reshape(-1)[:B]


if __name__ == "__main__":
    key = jax.random.PRNGKey(0)
    ks = jax.random.split(key, 7)
    params = {
        "w_conv": jax.random.normal(ks[0], (C_OUT, C_IN, KS), jnp.float32) * 0.05,
        "b_conv": jax.random.normal(ks[1], (C_OUT,), jnp.float32) * 0.05,
        "w_fc":   jax.random.normal(ks[2], (HID, FC_IN), jnp.float32) * 0.02,
        "b_fc":   jax.random.normal(ks[3], (HID,), jnp.float32) * 0.02,
        "w_fc2":  jax.random.normal(ks[4], (OUT_SIZE, HID), jnp.float32) * 0.05,
        "b_fc2":  jax.random.normal(ks[5], (OUT_SIZE,), jnp.float32) * 0.05,
    }

    B = 700  # current_batch_size < batch_size -> exercises the pad / slice path
    x = jax.random.normal(ks[6], (B, C_IN), jnp.float32)

    out = jax.block_until_ready(jax.jit(residue_cnn_forward)(x, params))
    ref = jax.block_until_ready(ref_forward(x, params))

    assert out.shape == (B,)
    # bf16 MXU operands vs f32 reference -> a few 1e-3 relative error expected.
    np.testing.assert_allclose(np.asarray(out), np.asarray(ref), rtol=5e-2, atol=5e-2)
    print("KERNEL_OK")
</pallas_src>

<mosaic_0001>
module attributes {stable_mosaic.version = 11 : i64} {
  func.func @residue_cnn_kernel(%arg0: i32, %arg1: memref<96x512xbf16, #tpu.memory_space<vmem>>, %arg2: memref<16x96xbf16, #tpu.memory_space<vmem>>, %arg3: memref<16x1xf32, #tpu.memory_space<vmem>>, %arg4: memref<1x4096x128xbf16, #tpu.memory_space<vmem>>, %arg5: memref<1x128xf32, #tpu.memory_space<vmem>>, %arg6: memref<128x1024xbf16, #tpu.memory_space<vmem>>, %arg7: memref<1x1024xf32, #tpu.memory_space<vmem>>, %arg8: memref<1x1024xf32, #tpu.memory_space<vmem>>, %arg9: memref<1x128xf32, #tpu.memory_space<vmem>>) attributes {dimension_semantics = [#tpu.dimension_semantics<arbitrary>], iteration_bounds = array<i64: 2>, scalar_prefetch = 0 : i64, scratch_operands = 1 : i64, tpu.core_type = #tpu.core_type<tc>, window_params = [{transform_indices = @transform_0, window_bounds = array<i64: 96, 512>}, {pipeline_mode = #tpu.pipeline_mode<synchronous>, transform_indices = @transform_1, window_bounds = array<i64: 16, 96>}, {pipeline_mode = #tpu.pipeline_mode<synchronous>, transform_indices = @transform_2, window_bounds = array<i64: 16, 1>}, {transform_indices = @transform_3, window_bounds = array<i64: 1, 4096, 128>}, {pipeline_mode = #tpu.pipeline_mode<synchronous>, transform_indices = @transform_4, window_bounds = array<i64: 1, 128>}, {pipeline_mode = #tpu.pipeline_mode<synchronous>, transform_indices = @transform_5, window_bounds = array<i64: 128, 1024>}, {pipeline_mode = #tpu.pipeline_mode<synchronous>, transform_indices = @transform_6, window_bounds = array<i64: 1, 1024>}, {pipeline_mode = #tpu.pipeline_mode<synchronous>, transform_indices = @transform_7, window_bounds = array<i64: 1, 1024>}]} {
    %c0_i32 = arith.constant 0 : i32
    %0 = arith.cmpi eq, %arg0, %c0_i32 : i32
    %1 = arith.extui %0 : i1 to i32
    %c0_i32_0 = arith.constant 0 : i32
    %2 = arith.cmpi ne, %1, %c0_i32_0 : i32
    scf.if %2 {
      %cst_16 = arith.constant 0.000000e+00 : f32
      %25 = vector.broadcast %cst_16 : f32 to vector<1x128xf32>
      %c0_17 = arith.constant 0 : index
      %c0_18 = arith.constant 0 : index
      %26 = vector.load %arg9[%c0_17, %c0_18] : memref<1x128xf32, #tpu.memory_space<vmem>>, vector<1x128xf32>
      tpu.vector_store %arg9[%c0_17, %c0_18], %25 {strides = array<i32>} : memref<1x128xf32, #tpu.memory_space<vmem>>, vector<1x128xf32>,
    } else {
    }
    %c0 = arith.constant 0 : index
    %c0_1 = arith.constant 0 : index
    %3 = vector.load %arg2[%c0, %c0_1] : memref<16x96xbf16, #tpu.memory_space<vmem>>, vector<16x96xbf16>
    %c0_2 = arith.constant 0 : index
    %c0_3 = arith.constant 0 : index
    %4 = vector.load %arg1[%c0_2, %c0_3] : memref<96x512xbf16, #tpu.memory_space<vmem>>, vector<96x512xbf16>
    %cst = arith.constant dense<0.000000e+00> : vector<16x512xf32>
    %5 = tpu.matmul %3, %4, %cst {dimension_numbers = #tpu.dot_dimension_numbers<[1], [0], [0], [1], [0, 0, 1, 1], [], []>} : vector<16x96xbf16>, vector<96x512xbf16>, vector<16x512xf32> -> vector<16x512xf32>
    %c0_4 = arith.constant 0 : index
    %c0_5 = arith.constant 0 : index
    %6 = vector.load %arg3[%c0_4, %c0_5] : memref<16x1xf32, #tpu.memory_space<vmem>>, vector<16x1xf32>
    %7 = vector.broadcast %6 : vector<16x1xf32> to vector<16x512xf32>
    %8 = arith.addf %5, %7 : vector<16x512xf32>
    %9 = vector.extract_strided_slice %8 {offsets = [0, 0], sizes = [16, 256], strides = [1, 1]} : vector<16x512xf32> to vector<16x256xf32>
    %10 = vector.extract_strided_slice %8 {offsets = [0, 256], sizes = [16, 256], strides = [1, 1]} : vector<16x512xf32> to vector<16x256xf32>
    %11 = arith.maximumf %9, %10 : vector<16x256xf32>
    %cst_6 = arith.constant 0.000000e+00 : f32
    %12 = vector.broadcast %cst_6 : f32 to vector<16x256xf32>
    %13 = arith.maximumf %11, %12 : vector<16x256xf32>
    %14 = vector.shape_cast %13 : vector<16x256xf32> to vector<1x4096xf32>
    %15 = arith.truncf %14 : vector<1x4096xf32> to vector<1x4096xbf16>
    %c0_7 = arith.constant 0 : index
    %c0_8 = arith.constant 0 : index
    %16 = vector.load %arg9[%c0_7, %c0_8] : memref<1x128xf32, #tpu.memory_space<vmem>>, vector<1x128xf32>
    %c0_9 = arith.constant 0 : index
    %c0_10 = arith.constant 0 : index
    %c0_11 = arith.constant 0 : index
    %17 = vector.load %arg4[%c0_9, %c0_10, %c0_11] : memref<1x4096x128xbf16, #tpu.memory_space<vmem>>, vector<1x4096x128xbf16>
    %18 = vector.shape_cast %17 : vector<1x4096x128xbf16> to vector<4096x128xbf16>
    %cst_12 = arith.constant dense<0.000000e+00> : vector<1x128xf32>
    %19 = tpu.matmul %15, %18, %cst_12 {dimension_numbers = #tpu.dot_dimension_numbers<[1], [0], [0], [1], [0, 0, 1, 1], [], []>} : vector<1x4096xbf16>, vector<4096x128xbf16>, vector<1x128xf32> -> vector<1x128xf32>
    %20 = arith.addf %16, %19 : vector<1x128xf32>
    %c0_13 = arith.constant 0 : index
    %c0_14 = arith.constant 0 : index
    %21 = vector.load %arg9[%c0_13, %c0_14] : memref<1x128xf32, #tpu.memory_space<vmem>>, vector<1x128xf32>
    tpu.vector_store %arg9[%c0_13, %c0_14], %20 {strides = array<i32>} : memref<1x128xf32, #tpu.memory_space<vmem>>, vector<1x128xf32>,
    %c1_i32 = arith.constant 1 : i32
    %22 = arith.cmpi eq, %arg0, %c1_i32 : i32
    %23 = arith.extui %22 : i1 to i32
    %c0_i32_15 = arith.constant 0 : i32
    %24 = arith.cmpi ne, %23, %c0_i32_15 : i32
    scf.if %24 {
      %c0_16 = arith.constant 0 : index
      %c0_17 = arith.constant 0 : index
      %25 = vector.load %arg9[%c0_16, %c0_17] : memref<1x128xf32, #tpu.memory_space<vmem>>, vector<1x128xf32>
      %c0_18 = arith.constant 0 : index
      %c0_19 = arith.constant 0 : index
      %26 = vector.load %arg5[%c0_18, %c0_19] : memref<1x128xf32, #tpu.memory_space<vmem>>, vector<1x128xf32>
      %27 = arith.addf %25, %26 : vector<1x128xf32>
      %cst_20 = arith.constant 0.000000e+00 : f32
      %28 = vector.broadcast %cst_20 : f32 to vector<1x128xf32>
      %29 = arith.maximumf %27, %28 : vector<1x128xf32>
      %30 = arith.truncf %29 : vector<1x128xf32> to vector<1x128xbf16>
      %c0_21 = arith.constant 0 : index
      %c0_22 = arith.constant 0 : index
      %31 = vector.load %arg6[%c0_21, %c0_22] : memref<128x1024xbf16, #tpu.memory_space<vmem>>, vector<128x1024xbf16>
      %cst_23 = arith.constant dense<0.000000e+00> : vector<1x1024xf32>
      %32 = tpu.matmul %30, %31, %cst_23 {dimension_numbers = #tpu.dot_dimension_numbers<[1], [0], [0], [1], [0, 0, 1, 1], [], []>} : vector<1x128xbf16>, vector<128x1024xbf16>, vector<1x1024xf32> -> vector<1x1024xf32>
      %c0_24 = arith.constant 0 : index
      %c0_25 = arith.constant 0 : index
      %33 = vector.load %arg7[%c0_24, %c0_25] : memref<1x1024xf32, #tpu.memory_space<vmem>>, vector<1x1024xf32>
      %34 = arith.addf %32, %33 : vector<1x1024xf32>
      %c0_26 = arith.constant 0 : index
      %c0_27 = arith.constant 0 : index
      %35 = vector.load %arg8[%c0_26, %c0_27] : memref<1x1024xf32, #tpu.memory_space<vmem>>, vector<1x1024xf32>
      tpu.vector_store %arg8[%c0_26, %c0_27], %34 {strides = array<i32>} : memref<1x1024xf32, #tpu.memory_space<vmem>>, vector<1x1024xf32>,
    } else {
    }
    return
  }
  func.func @transform_0(%arg0: i32) -> (i32, i32) {
    %c0_i32 = arith.constant 0 : i32
    %c0_i32_0 = arith.constant 0 : i32
    return %c0_i32, %arg0 : i32, i32
  }
  func.func @transform_1(%arg0: i32) -> (i32, i32) {
    %c0_i32 = arith.constant 0 : i32
    %c0_i32_0 = arith.constant 0 : i32
    %c0_i32_1 = arith.constant 0 : i32
    return %c0_i32, %c0_i32_0 : i32, i32
  }
  func.func @transform_2(%arg0: i32) -> (i32, i32) {
    %c0_i32 = arith.constant 0 : i32
    %c0_i32_0 = arith.constant 0 : i32
    %c0_i32_1 = arith.constant 0 : i32
    return %c0_i32, %c0_i32_0 : i32, i32
  }
  func.func @transform_3(%arg0: i32) -> (i32, i32, i32) {
    %c0_i32 = arith.constant 0 : i32
    %c0_i32_0 = arith.constant 0 : i32
    %c0_i32_1 = arith.constant 0 : i32
    return %arg0, %c0_i32, %c0_i32_0 : i32, i32, i32
  }
  func.func @transform_4(%arg0: i32) -> (i32, i32) {
    %c0_i32 = arith.constant 0 : i32
    %c0_i32_0 = arith.constant 0 : i32
    %c0_i32_1 = arith.constant 0 : i32
    return %c0_i32, %c0_i32_0 : i32, i32
  }
  func.func @transform_5(%arg0: i32) -> (i32, i32) {
    %c0_i32 = arith.constant 0 : i32
    %c0_i32_0 = arith.constant 0 : i32
    %c0_i32_1 = arith.constant 0 : i32
    return %c0_i32, %c0_i32_0 : i32, i32
  }
  func.func @transform_6(%arg0: i32) -> (i32, i32) {
    %c0_i32 = arith.constant 0 : i32
    %c0_i32_0 = arith.constant 0 : i32
    %c0_i32_1 = arith.constant 0 : i32
    return %c0_i32, %c0_i32_0 : i32, i32
  }
  func.func @transform_7(%arg0: i32) -> (i32, i32) {
    %c0_i32 = arith.constant 0 : i32
    %c0_i32_0 = arith.constant 0 : i32
    %c0_i32_1 = arith.constant 0 : i32
    return %c0_i32, %c0_i32_0 : i32, i32
  }
}

</mosaic_0001>

<bundles_post_ra>
// kernel: residue_cnn_forward.1
= control target key start
LH: loop header
LB: loop body
LE: loop exit
PB: predicated region body
PF: predicated region fallthrough
CT: control target
= control target key end

     0   :  { %s5356_s24 = smov 0   ;;  %s5358_s25 = smov 0   ;;  %s6154_s0 = inlined_call_operand.vmem [shape: bf16[96,1024], index: 0, kind: input, shape index: {}]   ;;  %s6155_s1 = inlined_call_operand.vmem [shape: bf16[16,96], index: 1, kind: input, shape index: {}]   ;;  %s6156_s2 = inlined_call_operand.vmem [shape: f32[16,1], index: 2, kind: input, shape index: {}]   ;;  %s6157_s3 = inlined_call_operand.vmem [shape: bf16[2,4096,128], index: 3, kind: input, shape index: {}]   ;;  %s6158_s4 = inlined_call_operand.vmem [shape: f32[1,128], index: 4, kind: input, shape index: {}]   ;;  %s6159_s5 = inlined_call_operand.vmem [shape: bf16[128,1024], index: 5, kind: input, shape index: {}]   ;;  %s6160_s6 = inlined_call_operand.vmem [shape: f32[1,1024], index: 6, kind: input, shape index: {}]   ;;  %s6161_s7 = inlined_call_operand.vmem [shape: f32[1,1024], index: 7, kind: output, shape index: {}]  }
   0x1   :  { %s5360_s26 = smov 0  }
   0x2 LB: > { %s5372_s27 = sadd.s32 4294967295, %s5309_s26   ;;  %s5375_s28 = sadd.s32 1, %s5309_s26   ;;  %s5309_s26 = sphi %s5360_s26, %s6164_s26   ;;  %s5305_s25 = sphi %s5358_s25, %s6163_s25   ;;  %s5301_s24 = sphi %s5356_s24, %s6162_s24  }
   0x3   : > { %s21_s29 = ssub.s32 %s5309_s26, %s5375_s28  ;;  %s24_s30 = sadd.s32 1, %s5305_s25 }
   0x4   : > { %p22_p0 = scmp.eq.s32.totalorder %s21_s29, 0  ;;  %p31_p1 = scmp.ne.s32.totalorder %s5305_s25, %s5301_s24 }
   0x5   : > { %p32_p2 = scmp.eq.s32.totalorder %s5309_s26, 0  ;;  %p4251_p4 = scmp.ge.s32.totalorder %s5309_s26, 2 }
   0x6   : > { %s5384_s8 = scalar_select %p22_p0, %s5305_s25, %s24_s30  }
   0x7   : > { %p33_p3 = por %p32_p2, %p31_p1  ;;  %224 = sbr.rel (%p4251_p4) target bundleno = 30 (0x1e), region = 36 }
   0xe   : > { %227 = sbr.rel (!%p33_p3) target bundleno = 30 (0x1e), region = 40  ;;  %s229_s9 = sand.u32 (%p33_p3), 1, %s5305_s25  }
   0xf   : > { %s4608_s10 = sshll.u32 (%p33_p3), %s5309_s26, 4  ;;  %s4962_s11 = smul.u32 (%p33_p3), 192, %s229_s9 }
  0x10   : > { %s5392_s14 = scalar_lea.vmem (%p33_p3), %s6154_s0, %s4608_s10 }
  0x11   : > { %v247_v0 = vld [vmem:[%s5392_s14] sm:$0xff] (%p33_p3)  ;;  %v249_v1 = vld [vmem:[%s5392_s14 + $0x8] sm:$0xff] (%p33_p3)  ;;  %s5400_s15 = scalar_lea.vmem (%p33_p3), [#allocation3], %s4962_s11 }
  0x12   : > { %v251_v2 = vld [vmem:[%s5392_s14 + $0x20] sm:$0xff] (%p33_p3)  ;;  %v253_v3 = vld [vmem:[%s5392_s14 + $0x28] sm:$0xff] (%p33_p3)  ;;  %248 = vst [vmem:[%s5400_s15] sm:$0xff] (%p33_p3), %v247_v0  ;;  %250 = vst [vmem:[%s5400_s15 + $0x8] sm:$0xff] (%p33_p3), %v249_v1 }
  0x13   : > { %v255_v4 = vld [vmem:[%s5392_s14 + $0x40] sm:$0xff] (%p33_p3)  ;;  %v257_v5 = vld [vmem:[%s5392_s14 + $0x48] sm:$0xff] (%p33_p3)  ;;  %252 = vst [vmem:[%s5400_s15 + $0x10] sm:$0xff] (%p33_p3), %v251_v2  ;;  %254 = vst [vmem:[%s5400_s15 + $0x18] sm:$0xff] (%p33_p3), %v253_v3 }
  0x14   : > { %256 = vst [vmem:[%s5400_s15 + $0x20] sm:$0xff] (%p33_p3), %v255_v4  ;;  %258 = vst [vmem:[%s5400_s15 + $0x28] sm:$0xff] (%p33_p3), %v257_v5  ;;  %v259_v6 = vld [vmem:[%s5392_s14 + $0x60] sm:$0xff] (%p33_p3)  ;;  %v261_v7 = vld [vmem:[%s5392_s14 + $0x68] sm:$0xff] (%p33_p3) }
  0x15   : > { %v263_v8 = vld [vmem:[%s5392_s14 + $0x80] sm:$0xff]  ;;  %260 = vst [vmem:[%s5400_s15 + $0x30] sm:$0xff] %v259_v6  ;;  %262 = vst [vmem:[%s5400_s15 + $0x38] sm:$0xff] %v261_v7  ;;  %v265_v9 = vld [vmem:[%s5392_s14 + $0x88] sm:$0xff] }
  0x16   : > { %264 = vst [vmem:[%s5400_s15 + $0x40] sm:$0xff] %v263_v8  ;;  %v267_v10 = vld [vmem:[%s5392_s14 + $0xa0] sm:$0xff]  ;;  %v269_v11 = vld [vmem:[%s5392_s14 + $0xa8] sm:$0xff]  ;;  %266 = vst [vmem:[%s5400_s15 + $0x48] sm:$0xff] %v265_v9 }
  0x17   : > { %268 = vst [vmem:[%s5400_s15 + $0x50] sm:$0xff] %v267_v10  ;;  %270 = vst [vmem:[%s5400_s15 + $0x58] sm:$0xff] %v269_v11  ;;  %v271_v12 = vld [vmem:[%s5392_s14 + $0xc0] sm:$0xff]  ;;  %v273_v13 = vld [vmem:[%s5392_s14 + $0xc8] sm:$0xff] }
  0x18   : > { %v275_v14 = vld [vmem:[%s5392_s14 + $0xe0] sm:$0xff]  ;;  %272 = vst [vmem:[%s5400_s15 + $0x60] sm:$0xff] %v271_v12  ;;  %274 = vst [vmem:[%s5400_s15 + $0x68] sm:$0xff] %v273_v13  ;;  %v277_v15 = vld [vmem:[%s5392_s14 + $0xe8] sm:$0xff] }
  0x19   : > { %276 = vst [vmem:[%s5400_s15 + $0x70] sm:$0xff] %v275_v14  ;;  %v279_v16 = vld [vmem:[%s5392_s14 + $0x100] sm:$0xff]  ;;  %v281_v17 = vld [vmem:[%s5392_s14 + $0x108] sm:$0xff]  ;;  %278 = vst [vmem:[%s5400_s15 + $0x78] sm:$0xff] %v277_v15 }
  0x1a   : > { %280 = vst [vmem:[%s5400_s15 + $0x80] sm:$0xff] %v279_v16  ;;  %282 = vst [vmem:[%s5400_s15 + $0x88] sm:$0xff] %v281_v17  ;;  %v283_v18 = vld [vmem:[%s5392_s14 + $0x120] sm:$0xff]  ;;  %v285_v19 = vld [vmem:[%s5392_s14 + $0x128] sm:$0xff] }
  0x1b   : > { %v287_v20 = vld [vmem:[%s5392_s14 + $0x140] sm:$0xff]  ;;  %284 = vst [vmem:[%s5400_s15 + $0x90] sm:$0xff] %v283_v18  ;;  %286 = vst [vmem:[%s5400_s15 + $0x98] sm:$0xff] %v285_v19  ;;  %v289_v21 = vld [vmem:[%s5392_s14 + $0x148] sm:$0xff] }
  0x1c   : > { %288 = vst [vmem:[%s5400_s15 + $0xa0] sm:$0xff] %v287_v20  ;;  %v291_v22 = vld [vmem:[%s5392_s14 + $0x160] sm:$0xff]  ;;  %v293_v23 = vld [vmem:[%s5392_s14 + $0x168] sm:$0xff]  ;;  %290 = vst [vmem:[%s5400_s15 + $0xa8] sm:$0xff] %v289_v21 }
  0x1d   : > { %292 = vst [vmem:[%s5400_s15 + $0xb0] sm:$0xff] %v291_v22  ;;  %294 = vst [vmem:[%s5400_s15 + $0xb8] sm:$0xff] %v293_v23 }
  0x1e PF: > { %p4254_p5 = scmp.ge.s32.totalorder %s5309_s26, 1  ;;  %p307_p6 = scmp.lt.s32.totalorder %s5309_s26, 3 }
  0x20   : > { %p308_p7 = pnand %p4254_p5, %p307_p6 }
  0x21   : > { %s314_s16 = sand.u32 (!%p308_p7), 1, %s5301_s24   ;;  %p346_p8 = scmp.lt.s32.totalorder (!%p308_p7), %s5372_s27, 1 }
  0x22   : > { %311 = sbr.rel (%p308_p7) target bundleno = 1021 (0x3fd), region = 67  ;;  %p4257_p9 = scmp.ne.s32.totalorder (!%p308_p7), %s5372_s27, 0 }
  0x23   : > { %s4963_s17 = smul.u32 (!%p308_p7), 192, %s314_s16 }
  0x25   : > { %s5454_s23 = scalar_lea.vmem (!%p308_p7), [#allocation3], %s4963_s17 }
  0x29   : > { %s347_s18 = scalar_select %p346_p8, %s5372_s27, 1 }
  0x2a   : > { %355 = sbr.rel (%p4257_p9) target bundleno = 49 (0x31), region = 75  ;;  %v5311_v24 = vmov (!%p4257_p9), 0.0  }
  0x2b   : > { %s4609_s19 = sshll.u32 %s347_s18, 11  ;;  %356 = vst [vmem:[#allocation2] sm:$0x1] (!%p4257_p9), %v5311_v24 }
  0x2c   : > { %s5452_s22 = scalar_lea.vmem %s6157_s3, %s4609_s19 }
  0x31 PF: > { %v4994_v25 = vld [vmem:[%s5454_s23 + $0x4] ss:$16 sps:$4 sm:$0xff]   ;;  %v4996_v26 = vld [vmem:[%s5454_s23 + $0xc] ss:$16 sps:$4 sm:$0xff]   ;;  %v5312_v27 = vmov 0   ;;  %vm520_vm0 = vcmask 785408  }
  0x32   : > { %556 = vmatprep.mubr.bf16.mxu0 %v5312_v27  ;;  %599 = vmatprep.mubr.bf16.mxu1 %v5312_v27  ;;  %v4998_v28 = vld [vmem:[%s5454_s23] ss:$16 sps:$4 sm:$0xff]   ;;  %v4999_v29 = vld [vmem:[%s5454_s23 + $0x8] ss:$16 sps:$4 sm:$0xff]   ;;  %v5000_v30 = vld [vmem:[%s5454_s23 + $0x24] ss:$16 sps:$4 sm:$0xff]  }
  0x33   : > { %524 = vmatprep.subr.bf16.mxu0 %v4994_v25  ;;  %4993 = vset.pattern.permute.xlu0 %v5312_v27  ;;  %v5002_v31 = vld [vmem:[%s5454_s23 + $0x2c] ss:$16 sps:$4 sm:$0xff]   ;;  %v5004_v32 = vld [vmem:[%s5454_s23 + $0x20] ss:$16 sps:$4 sm:$0xff]   ;;  %v5005_v33 = vld [vmem:[%s5454_s23 + $0x28] ss:$16 sps:$4 sm:$0xff]  }
  0x34   : > { %567 = vmatprep.subr.bf16.mxu1 %v4996_v26  ;;  %525 = vmatpush1.bf16.msra.mxu0 %v4998_v28  ;;  %v5006_v34 = vld [vmem:[%s5454_s23 + $0x44] ss:$16 sps:$4 sm:$0xff]   ;;  %v5008_v35 = vld [vmem:[%s5454_s23 + $0x4c] ss:$16 sps:$4 sm:$0xff]   ;;  %v5010_v36 = vld [vmem:[%s5454_s23 + $0x40] ss:$16 sps:$4 sm:$0xff]   ;;  %v633_v26 = vlaneseq }
  0x35   : > { %568 = vmatpush1.bf16.msra.mxu1 %v4999_v29  ;;  %526 = vmatprep.subr.bf16.mxu0 %v5000_v30  ;;  %v5011_v37 = vld [vmem:[%s5454_s23 + $0x48] ss:$16 sps:$4 sm:$0xff]   ;;  %v5012_v38 = vld [vmem:[%s5454_s23 + $0x64] ss:$16 sps:$4 sm:$0xff]   ;;  %v5014_v39 = vld [vmem:[%s5454_s23 + $0x6c] ss:$16 sps:$4 sm:$0xff]  }
  0x36   : > { %569 = vmatprep.subr.bf16.mxu1 %v5002_v31  ;;  %v5016_v40 = vld [vmem:[%s5454_s23 + $0x60] ss:$16 sps:$4 sm:$0xff]   ;;  %v5017_v41 = vld [vmem:[%s5454_s23 + $0x68] ss:$16 sps:$4 sm:$0xff]   ;;  %v5018_v42 = vld [vmem:[%s5454_s23 + $0x84] ss:$16 sps:$4 sm:$0xff]  }
  0x37   : > { %v5020_v43 = vld [vmem:[%s5454_s23 + $0x8c] ss:$16 sps:$4 sm:$0xff]   ;;  %v5022_v44 = vld [vmem:[%s5454_s23 + $0x80] ss:$16 sps:$4 sm:$0xff]   ;;  %v5023_v45 = vld [vmem:[%s5454_s23 + $0x88] ss:$16 sps:$4 sm:$0xff]  }
  0x38   : > { %527 = vmatpush1.bf16.msra.mxu0 %v5004_v32  ;;  %v5024_v46 = vld [vmem:[%s5454_s23 + $0xa4] ss:$16 sps:$4 sm:$0xff]   ;;  %v5026_v47 = vld [vmem:[%s5454_s23 + $0xac] ss:$16 sps:$4 sm:$0xff]   ;;  %v5028_v49 = vld [vmem:[%s5454_s23 + $0xa0] ss:$16 sps:$4 sm:$0xff]  }
  0x39   : > { %570 = vmatpush1.bf16.msra.mxu1 %v5005_v33  ;;  %528 = vmatprep.subr.bf16.mxu0 %v5006_v34  ;;  %v383_v48 = vld [vmem:[%s6156_s2] sm:$0xff]  ;;  %v5029_v50 = vld [vmem:[%s5454_s23 + $0xa8] ss:$16 sps:$4 sm:$0xff]   ;;  %v5039_v61 = vld [vmem:[%s5452_s22 + $0x50] sm:$0xff]   ;;  %v5313_v24 = vmov 1935823168  }
  0x3a   : > { %571 = vmatprep.subr.bf16.mxu1 %v5008_v35  ;;  %387 = vperm.xlu0 %4993, %v383_v48   ;;  %v384_v51 = vld [vmem:[%s6156_s2 + $0x8] sm:$0xff]  ;;  %v5031_v52 = vld [vmem:[%s5452_s22 + $0x40] sm:$0xff]   ;;  %v5040_v62 = vld [vmem:[%s5452_s22 + $0xd0] sm:$0xff]   ;;  %v631_v25 = vunpack.c.l.s4 %v5313_v24  ;;  %p4541_p10 = scmp.ne.s32.totalorder %s5372_s27, 1 }
  0x3b   : > { %v5030_v53 = vld [vmem:[%s6155_s1] sm:$0xff]   ;;  %v5035_v57 = vld [vmem:[%s5452_s22 + $0x48] sm:$0xff]   ;;  %v5041_v63 = vld [vmem:[%s5452_s22 + $0x10] sm:$0xff]  }
  0x3c   : > { %529 = vmatpush1.bf16.msra.mxu0 %v5010_v36  ;;  %v5032_v54 = vld [vmem:[%s5452_s22 + $0xc0] sm:$0xff]   ;;  %v5036_v58 = vld [vmem:[%s5452_s22 + $0xc8] sm:$0xff]   ;;  %v5042_v0 = vld [vmem:[%s5452_s22 + $0x90] sm:$0xff]   ;;  %v632_v36 = vunpack.c.0.s8 %v631_v25 }
  0x3d   : > { %572 = vmatpush1.bf16.msra.mxu1 %v5011_v37  ;;  %530 = vmatprep.subr.bf16.mxu0 %v5012_v38  ;;  %v5033_v55 = vld [vmem:[%s5452_s22] sm:$0xff]   ;;  %v5037_v59 = vld [vmem:[%s5452_s22 + $0x8] sm:$0xff]   ;;  %v5043_v1 = vld [vmem:[%s5452_s22 + $0x58] sm:$0xff]   ;;  %v5524_v37 = vshrl.u32 %v633_v26, 7 }
  0x3e   : > { %573 = vmatprep.subr.bf16.mxu1 %v5014_v39  ;;  %392 = vperm.xlu0 %4993, %v384_v51   ;;  %v5034_v56 = vld [vmem:[%s5452_s22 + $0x80] sm:$0xff]   ;;  %v5038_v60 = vld [vmem:[%s5452_s22 + $0x88] sm:$0xff]   ;;  %v5044_v2 = vld [vmem:[%s5452_s22 + $0xd8] sm:$0xff]  }
  0x3f   : > { %v5045_v3 = vld [vmem:[%s5452_s22 + $0x18] sm:$0xff]   ;;  %v5047_v5 = vld [vmem:[%s5452_s22 + $0x60] sm:$0xff]   ;;  %v5051_v9 = vld [vmem:[%s5452_s22 + $0x68] sm:$0xff]   ;;  %v635_v51 = vsub.s32 %v632_v36, %v5524_v37 }
  0x40   : > { %531 = vmatpush1.bf16.msra.mxu0 %v5016_v40  ;;  %v5046_v4 = vld [vmem:[%s5452_s22 + $0x98] sm:$0xff]   ;;  %v5048_v6 = vld [vmem:[%s5452_s22 + $0xe0] sm:$0xff]   ;;  %v5052_v10 = vld [vmem:[%s5452_s22 + $0xe8] sm:$0xff]  }
  0x41   : > { %574 = vmatpush1.bf16.msra.mxu1 %v5017_v41  ;;  %532 = vmatprep.subr.bf16.mxu0 %v5018_v42  ;;  %v5049_v7 = vld [vmem:[%s5452_s22 + $0x20] sm:$0xff]   ;;  %v5053_v11 = vld [vmem:[%s5452_s22 + $0x28] sm:$0xff]   ;;  %v5055_v13 = vld [vmem:[%s5452_s22 + $0x70] sm:$0xff]  }
  0x42   : > { %575 = vmatprep.subr.bf16.mxu1 %v5020_v43  ;;  %v5050_v8 = vld [vmem:[%s5452_s22 + $0xa0] sm:$0xff]   ;;  %v5054_v12 = vld [vmem:[%s5452_s22 + $0xa8] sm:$0xff]   ;;  %v5056_v14 = vld [vmem:[%s5452_s22 + $0xf0] sm:$0xff]  }
  0x43   : > { %v5057_v15 = vld [vmem:[%s5452_s22 + $0x30] sm:$0xff]   ;;  %v5059_v17 = vld [vmem:[%s5452_s22 + $0x78] sm:$0xff]   ;;  %v5063_v21 = vld [vmem:[%s5452_s22 + $0x140] sm:$0xff]  }
  0x44   : > { %533 = vmatpush1.bf16.msra.mxu0 %v5022_v44  ;;  %v5058_v16 = vld [vmem:[%s5452_s22 + $0xb0] sm:$0xff]   ;;  %v5060_v18 = vld [vmem:[%s5452_s22 + $0xf8] sm:$0xff]   ;;  %v5064_v22 = vld [vmem:[%s5452_s22 + $0x1c0] sm:$0xff]  }
  0x45   : > { %576 = vmatpush1.bf16.msra.mxu1 %v5023_v45  ;;  %534 = vmatprep.subr.bf16.mxu0 %v5024_v46  ;;  %v5061_v19 = vld [vmem:[%s5452_s22 + $0x38] sm:$0xff]   ;;  %v5069_v25 = vld [vmem:[%s5452_s22 + $0x108] sm:$0xff]   ;;  %v5073_v36 = vld [vmem:[%s5452_s22 + $0x110] sm:$0xff]  }
  0x46   : > { %577 = vmatprep.subr.bf16.mxu1 %v5026_v47  ;;  %v5062_v20 = vld [vmem:[%s5452_s22 + $0xb8] sm:$0xff]   ;;  %v5070_v26 = vld [vmem:[%s5452_s22 + $0x188] sm:$0xff]  }
  0x48   : > { %535 = vmatpush1.bf16.msra.mxu0 %v5028_v49 }
  0x49   : > { %578 = vmatpush1.bf16.msra.mxu1 %v5029_v50  ;;  %4610 = vmatprep.subr.bf16.mxu0 %v5031_v52 }
  0x4a   : > { %4632 = vmatprep.subr.bf16.mxu1 %v5032_v54  ;;  %v5528_v54 = vsub.s32 1, %v5524_v37 }
  0x4b   : > { %4283 = vmatmul.mubr.msk.bf16.vlgmr.msra.gmra.mrb[0].mxu0 %vm520_vm0, %v5030_v53 }
  0x4c   : > { %4284 = vmatmul.mubr.msk.bf16.vlgmr.msra.gmra.mrb[0].mxu1 %vm520_vm0, %v5030_v53  ;;  %4611 = vmatpush3.bf16.msra.mxu0 %v5033_v55 }
  0x4d   : > { %4633 = vmatpush3.bf16.msra.mxu1 %v5034_v56  ;;  %4612 = vmatprep.subr.bf16.mxu0 %v5035_v57 }
  0x4e   : > { %4634 = vmatprep.subr.bf16.mxu1 %v5036_v58  ;;  %v5531_v58 = vsub.s32 3, %v5524_v37 }
  0x50   : > { %4613 = vmatpush3.bf16.msra.mxu0 %v5037_v59  ;;  %v5534_v59 = vsub.s32 0, %v5524_v37 }
  0x51   : > { %4635 = vmatpush3.bf16.msra.mxu1 %v5038_v60  ;;  %4614 = vmatprep.subr.bf16.mxu0 %v5039_v61  ;;  %v5537_v60 = vsub.s32 2, %v5524_v37  ;;  %v5540_v61 = vsub.s32 5, %v5524_v37 }
  0x52   : > { %4636 = vmatprep.subr.bf16.mxu1 %v5040_v62  ;;  %v5543_v62 = vsub.s32 7, %v5524_v37 }
  0x54   : > { %4615 = vmatpush3.bf16.msra.mxu0 %v5041_v63 }
  0x55   : > { %4637 = vmatpush3.bf16.msra.mxu1 %v5042_v0  ;;  %4616 = vmatprep.subr.bf16.mxu0 %v5043_v1 }
  0x56   : > { %4638 = vmatprep.subr.bf16.mxu1 %v5044_v2 }
  0x58   : > { %4617 = vmatpush3.bf16.msra.mxu0 %v5045_v3 }
  0x59   : > { %4639 = vmatpush3.bf16.msra.mxu1 %v5046_v4  ;;  %4618 = vmatprep.subr.bf16.mxu0 %v5047_v5 }
  0x5a   : > { %4640 = vmatprep.subr.bf16.mxu1 %v5048_v6 }
  0x5c   : > { %4619 = vmatpush3.bf16.msra.mxu0 %v5049_v7 }
  0x5d   : > { %4641 = vmatpush3.bf16.msra.mxu1 %v5050_v8  ;;  %4620 = vmatprep.subr.bf16.mxu0 %v5051_v9 }
  0x5e   : > { %4642 = vmatprep.subr.bf16.mxu1 %v5052_v10 }
  0x60   : > { %4621 = vmatpush3.bf16.msra.mxu0 %v5053_v11 }
  0x61   : > { %4643 = vmatpush3.bf16.msra.mxu1 %v5054_v12  ;;  %4622 = vmatprep.subr.bf16.mxu0 %v5055_v13  ;;  %v5065_v13 = vld [vmem:[%s5452_s22 + $0x100] sm:$0xff]  }
  0x62   : > { %4644 = vmatprep.subr.bf16.mxu1 %v5056_v14  ;;  %v5066_v14 = vld [vmem:[%s5452_s22 + $0x180] sm:$0xff]  }
  0x64   : > { %4623 = vmatpush3.bf16.msra.mxu0 %v5057_v15 }
  0x65   : > { %4645 = vmatpush3.bf16.msra.mxu1 %v5058_v16  ;;  %4624 = vmatprep.subr.bf16.mxu0 %v5059_v17 }
  0x66   : > { %4646 = vmatprep.subr.bf16.mxu1 %v5060_v18  ;;  %v5067_v18 = vld [vmem:[%s5452_s22 + $0x148] sm:$0xff]  }
  0x68   : > { %4625 = vmatpush3.bf16.msra.mxu0 %v5061_v19  ;;  %v5068_v19 = vld [vmem:[%s5452_s22 + $0x1c8] sm:$0xff]  }
  0x69   : > { %4647 = vmatpush3.bf16.msra.mxu1 %v5062_v20  ;;  %4654 = vmatprep.subr.bf16.mxu0 %v5063_v21  ;;  %v5568_v20 = vsub.s32 4, %v5524_v37 }
  0x6a   : > { %4676 = vmatprep.subr.bf16.mxu1 %v5064_v22  ;;  %v5571_v22 = vsub.s32 6, %v5524_v37 }
  0xb9   : > { %v388_v23 = vpop.permute.xlu0 %387 }
  0xbd   : > { %v393_v27 = vpop.permute.xlu0 %392 }
 0x11e   : > { %v558_v28 = vpop.f32.mrb[0].mxu0 }
 0x11f   : > { %v601_v29 = vpop.f32.mrb[0].mxu1  ;;  %v559_v30 = vadd.f32 %v558_v28, %v388_v23  ;;  %v560_v32 = vpop.f32.mrb[1].mxu0 }
 0x120   : > { %v602_v31 = vadd.f32 %v601_v29, %v388_v23  ;;  %v603_v33 = vpop.f32.mrb[1].mxu1  ;;  %v561_v34 = vadd.f32 %v560_v32, %v388_v23  ;;  %v562_v38 = vpop.f32.mrb[2].mxu0  ;;  %v5071_v29 = vld [vmem:[%s5452_s22 + $0x150] sm:$0xff]  }
 0x121   : > { %v604_v35 = vadd.f32 %v603_v33, %v388_v23  ;;  %v605_v39 = vpop.f32.mrb[2].mxu1  ;;  %v563_v41 = vadd.f32 %v562_v38, %v393_v27  ;;  %v564_v43 = vpop.f32.mrb[3].mxu0  ;;  %v5074_v38 = vld [vmem:[%s5452_s22 + $0x190] sm:$0xff]  }
 0x122   : > { %v610_v40 = vmax.f32 %v559_v30, %v602_v31  ;;  %v606_v42 = vadd.f32 %v605_v39, %v393_v27  ;;  %v607_v44 = vpop.f32.mrb[3].mxu1  ;;  %v565_v46 = vadd.f32 %v564_v43, %v393_v27  ;;  %v5072_v30 = vld [vmem:[%s5452_s22 + $0x1d0] sm:$0xff]  }
 0x123   : > { %v611_v45 = vmax.f32 %v561_v34, %v604_v35  ;;  %v608_v47 = vadd.f32 %v607_v44, %v393_v27 }
 0x124   : > { %v614_v48 = vmax.f32 %v610_v40, 0.0  ;;  %v612_v49 = vmax.f32 %v563_v41, %v606_v42  ;;  %v5075_v41 = vld [vmem:[%s5452_s22 + $0x158] sm:$0xff]  }
 0x125   : > { %v615_v50 = vmax.f32 %v611_v45, 0.0  ;;  %v613_v52 = vmax.f32 %v565_v46, %v608_v47  ;;  %v5076_v42 = vld [vmem:[%s5452_s22 + $0x1d8] sm:$0xff]  }
 0x126   : > { %v616_v53 = vmax.f32 %v612_v49, 0.0  ;;  %v5078_v49 = vld [vmem:[%s5452_s22 + $0x198] sm:$0xff]  }
 0x127   : > { %v622_v55 = vcombine.low %v614_v48, %v615_v50  ;;  %v623_v56 = vcombine.high %v614_v48, %v615_v50  ;;  %v617_v57 = vmax.f32 %v613_v52, 0.0  ;;  %v5077_v48 = vld [vmem:[%s5452_s22 + $0x118] sm:$0xff]   ;;  %v5079_v52 = vld [vmem:[%s5452_s22 + $0x160] sm:$0xff]  }
 0x129   : > { %v5545_v63 = vrot.slane %v622_v55, %v635_v51  ;;  %v624_v0 = vcombine.low %v616_v53, %v617_v57  ;;  %v625_v1 = vcombine.high %v616_v53, %v617_v57  ;;  %v5547_v2 = vrot.slane %v623_v56, %v635_v51  ;;  %v5080_v53 = vld [vmem:[%s5452_s22 + $0x1e0] sm:$0xff]  }
 0x12b   : > { %v650_v3 = vrot.slane %v624_v0, %v635_v51  ;;  %v5549_v4 = vrot.slane %v625_v1, %v635_v51  ;;  %v669_v5 = vrot.slane %v5545_v63, %v5528_v54  ;;  %v677_v6 = vrot.slane %v5545_v63, %v5531_v58  ;;  %v5081_v1 = vld [vmem:[%s5452_s22 + $0x120] sm:$0xff]  }
 0x12c   : > { %v665_v7 = vrot.slane %v5545_v63, %v5534_v59  ;;  %v673_v8 = vrot.slane %v5545_v63, %v5537_v60  ;;  %v685_v9 = vrot.slane %v5545_v63, %v5540_v61  ;;  %v693_v10 = vrot.slane %v5545_v63, %v5543_v62 }
 0x12d   : > { %v823_v11 = vpack.c.bf16 %v669_v5, %v669_v5  ;;  %v825_v12 = vpack.c.bf16 %v677_v6, %v677_v6  ;;  %v5575_v23 = vrot.slane %v5547_v2, %v5534_v59  ;;  %v5579_v24 = vrot.slane %v5547_v2, %v5537_v60  ;;  %v5083_v5 = vld [vmem:[%s5452_s22 + $0x168] sm:$0xff]  }
 0x12e   : > { %v822_v15 = vpack.c.bf16 %v665_v7, %v665_v7  ;;  %v824_v16 = vpack.c.bf16 %v673_v8, %v673_v8  ;;  %v827_v17 = vpack.c.bf16 %v685_v9, %v685_v9  ;;  %v829_v21 = vpack.c.bf16 %v693_v10, %v693_v10  ;;  %v5084_v6 = vld [vmem:[%s5452_s22 + $0x1e8] sm:$0xff]   ;;  %v5088_v9 = vld [vmem:[%s5452_s22 + $0x1f0] sm:$0xff]  }
 0x12f   : > { %2935 = vmatprep.mubr.bf16.mxu0 %v823_v11  ;;  %2975 = vmatprep.mubr.bf16.mxu1 %v825_v12  ;;  %v5585_v27 = vrot.slane %v5547_v2, %v5540_v61  ;;  %v5589_v28 = vrot.slane %v5547_v2, %v5543_v62  ;;  %v5595_v31 = vrot.slane %v5547_v2, %v5568_v20  ;;  %v5085_v7 = vld [vmem:[%s5452_s22 + $0x128] sm:$0xff]   ;;  %v5089_v10 = vld [vmem:[%s5452_s22 + $0x130] sm:$0xff]   ;;  %v5091_v12 = vld [vmem:[%s5452_s22 + $0x178] sm:$0xff]  }
 0x130   : > { %2936 = vmatmul.mubr.bf16.vlgmr.msra.gmra.mrb[4].mxu0 %v822_v15  ;;  %2976 = vmatmul.mubr.bf16.vlgmr.msra.gmra.mrb[4].mxu1 %v824_v16  ;;  %v5599_v32 = vrot.slane %v5547_v2, %v5571_v22  ;;  %v5602_v33 = vrot.slane %v650_v3, %v5528_v54  ;;  %v5605_v34 = vrot.slane %v650_v3, %v5531_v58  ;;  %v5086_v8 = vld [vmem:[%s5452_s22 + $0x1a8] sm:$0xff]   ;;  %v5090_v11 = vld [vmem:[%s5452_s22 + $0x1b0] sm:$0xff]   ;;  %v5094_v15 = vld [vmem:[%s5452_s22 + $0x1b8] sm:$0xff]  }
 0x131   : > { %4655 = vmatpush3.bf16.msra.mxu0 %v5065_v13  ;;  %4677 = vmatpush3.bf16.msra.mxu1 %v5066_v14  ;;  %v5608_v35 = vrot.slane %v650_v3, %v5534_v59  ;;  %v5613_v39 = vrot.slane %v650_v3, %v5537_v60  ;;  %v5616_v40 = vrot.slane %v650_v3, %v5540_v61  ;;  %v5092_v13 = vld [vmem:[%s5452_s22 + $0x1f8] sm:$0xff]  }
 0x132   : > { %3015 = vmatprep.mubr.bf16.mxu0 %v827_v17  ;;  %3055 = vmatprep.mubr.bf16.mxu1 %v829_v21  ;;  %v5621_v43 = vrot.slane %v650_v3, %v5543_v62  ;;  %v5624_v44 = vrot.slane %v650_v3, %v5568_v20  ;;  %v5627_v45 = vrot.slane %v650_v3, %v5571_v22  ;;  %v5082_v3 = vld [vmem:[%s5452_s22 + $0x1a0] sm:$0xff]   ;;  %v5093_v14 = vld [vmem:[%s5452_s22 + $0x138] sm:$0xff]  }
 0x133   : > { %4656 = vmatprep.subr.bf16.mxu0 %v5067_v18  ;;  %4678 = vmatprep.subr.bf16.mxu1 %v5068_v19  ;;  %v5631_v46 = vrot.slane %v5549_v4, %v5528_v54  ;;  %v5635_v47 = vrot.slane %v5549_v4, %v5531_v58  ;;  %v5641_v50 = vrot.slane %v5549_v4, %v5534_v59  ;;  %v5095_v18 = vld [vmem:[%s5452_s22 + $0x240] sm:$0xff]  }
 0x134   : > { %v5645_v51 = vrot.slane %v5549_v4, %v5537_v60  ;;  %v5651_v55 = vrot.slane %v5549_v4, %v5540_v61  ;;  %v5655_v56 = vrot.slane %v5549_v4, %v5543_v62  ;;  %v5659_v57 = vrot.slane %v5549_v4, %v5568_v20  ;;  %v5096_v19 = vld [vmem:[%s5452_s22 + $0x2c0] sm:$0xff]  }
 0x135   : > { %4657 = vmatpush3.bf16.msra.mxu0 %v5069_v25  ;;  %4679 = vmatpush3.bf16.msra.mxu1 %v5070_v26  ;;  %v5663_v0 = vrot.slane %v5549_v4, %v5571_v22  ;;  %v5087_v4 = vld [vmem:[%s5452_s22 + $0x170] sm:$0xff]   ;;  %v681_v16 = vrot.slane %v5545_v63, %v5568_v20  ;;  %v689_v17 = vrot.slane %v5545_v63, %v5571_v22  ;;  %v5097_v26 = vld [vmem:[%s5452_s22 + $0x200] sm:$0xff]  }
 0x136   : > { %4658 = vmatprep.subr.bf16.mxu0 %v5071_v29  ;;  %4680 = vmatprep.subr.bf16.mxu1 %v5072_v30  ;;  %v701_v21 = vrot.slane %v5547_v2, %v5528_v54  ;;  %v709_v25 = vrot.slane %v5547_v2, %v5531_v58 }
 0x137   : > { %v826_v29 = vpack.c.bf16 %v681_v16, %v681_v16  ;;  %v828_v30 = vpack.c.bf16 %v689_v17, %v689_v17  ;;  %v5120_v16 = vld [vmem:[%s5452_s22 + $0x2f0] sm:$0xff]  }
 0x138   : > { %v831_v63 = vpack.c.bf16 %v701_v21, %v701_v21  ;;  %v833_v2 = vpack.c.bf16 %v709_v25, %v709_v25  ;;  %v5121_v17 = vld [vmem:[%s5452_s22 + $0x230] sm:$0xff]   ;;  %v5124_v21 = vld [vmem:[%s5452_s22 + $0x2f8] sm:$0xff]  }
 0x139   : > { %4659 = vmatpush3.bf16.msra.mxu0 %v5073_v36  ;;  %4681 = vmatpush3.bf16.msra.mxu1 %v5074_v38  ;;  %v5098_v36 = vld [vmem:[%s5452_s22 + $0x280] sm:$0xff]   ;;  %v5099_v38 = vld [vmem:[%s5452_s22 + $0x248] sm:$0xff]   ;;  %v5125_v25 = vld [vmem:[%s5452_s22 + $0x238] sm:$0xff]  }
 0x13a   : > { %4660 = vmatprep.subr.bf16.mxu0 %v5075_v41  ;;  %4682 = vmatprep.subr.bf16.mxu1 %v5076_v42  ;;  %v5100_v41 = vld [vmem:[%s5452_s22 + $0x2c8] sm:$0xff]  }
 0x13b   : > { %v5101_v42 = vld [vmem:[%s5452_s22 + $0x208] sm:$0xff]  }
 0x13d   : > { %4661 = vmatpush3.bf16.msra.mxu0 %v5077_v48  ;;  %4683 = vmatpush3.bf16.msra.mxu1 %v5078_v49  ;;  %v5102_v48 = vld [vmem:[%s5452_s22 + $0x288] sm:$0xff]   ;;  %v5103_v49 = vld [vmem:[%s5452_s22 + $0x250] sm:$0xff]  }
 0x13e   : > { %4662 = vmatprep.subr.bf16.mxu0 %v5079_v52  ;;  %4684 = vmatprep.subr.bf16.mxu1 %v5080_v53  ;;  %v5104_v52 = vld [vmem:[%s5452_s22 + $0x2d0] sm:$0xff]  }
 0x13f   : > { %v5105_v53 = vld [vmem:[%s5452_s22 + $0x210] sm:$0xff]  }
 0x141   : > { %4663 = vmatpush3.bf16.msra.mxu0 %v5081_v1  ;;  %4685 = vmatpush3.bf16.msra.mxu1 %v5082_v3  ;;  %v5106_v1 = vld [vmem:[%s5452_s22 + $0x290] sm:$0xff]   ;;  %v5107_v3 = vld [vmem:[%s5452_s22 + $0x258] sm:$0xff]  }
 0x142   : > { %4664 = vmatprep.subr.bf16.mxu0 %v5083_v5  ;;  %4686 = vmatprep.subr.bf16.mxu1 %v5084_v6  ;;  %v5108_v5 = vld [vmem:[%s5452_s22 + $0x2d8] sm:$0xff]  }
 0x143   : > { %v5109_v6 = vld [vmem:[%s5452_s22 + $0x218] sm:$0xff]  }
 0x145   : > { %4665 = vmatpush3.bf16.msra.mxu0 %v5085_v7  ;;  %4687 = vmatpush3.bf16.msra.mxu1 %v5086_v8  ;;  %v5110_v7 = vld [vmem:[%s5452_s22 + $0x298] sm:$0xff]   ;;  %v5111_v8 = vld [vmem:[%s5452_s22 + $0x260] sm:$0xff]  }
 0x146   : > { %4666 = vmatprep.subr.bf16.mxu0 %v5087_v4  ;;  %4688 = vmatprep.subr.bf16.mxu1 %v5088_v9  ;;  %v5112_v4 = vld [vmem:[%s5452_s22 + $0x2e0] sm:$0xff]  }
 0x147   : > { %v5113_v9 = vld [vmem:[%s5452_s22 + $0x220] sm:$0xff]  }
 0x149   : > { %4667 = vmatpush3.bf16.msra.mxu0 %v5089_v10  ;;  %4689 = vmatpush3.bf16.msra.mxu1 %v5090_v11  ;;  %v5114_v10 = vld [vmem:[%s5452_s22 + $0x2a0] sm:$0xff]   ;;  %v5115_v11 = vld [vmem:[%s5452_s22 + $0x268] sm:$0xff]  }
 0x14a   : > { %4668 = vmatprep.subr.bf16.mxu0 %v5091_v12  ;;  %4690 = vmatprep.subr.bf16.mxu1 %v5092_v13  ;;  %v5116_v12 = vld [vmem:[%s5452_s22 + $0x2e8] sm:$0xff]  }
 0x14b   : > { %v5117_v13 = vld [vmem:[%s5452_s22 + $0x228] sm:$0xff]  }
 0x14d   : > { %4669 = vmatpush3.bf16.msra.mxu0 %v5093_v14  ;;  %4691 = vmatpush3.bf16.msra.mxu1 %v5094_v15  ;;  %v5118_v14 = vld [vmem:[%s5452_s22 + $0x2a8] sm:$0xff]   ;;  %v5119_v15 = vld [vmem:[%s5452_s22 + $0x270] sm:$0xff]  }
 0x14e   : > { %4698 = vmatprep.subr.bf16.mxu0 %v5095_v18  ;;  %4720 = vmatprep.subr.bf16.mxu1 %v5096_v19  ;;  %v5122_v18 = vld [vmem:[%s5452_s22 + $0x2b0] sm:$0xff]   ;;  %v5123_v19 = vld [vmem:[%s5452_s22 + $0x278] sm:$0xff]  }
 0x150   : > { %3016 = vmatmul.mubr.bf16.vlgmr.msra.gmra.mrb[8].mxu0 %v826_v29  ;;  %3056 = vmatmul.mubr.bf16.vlgmr.msra.gmra.mrb[8].mxu1 %v828_v30  ;;  %v5127_v29 = vld [vmem:[%s5452_s22 + $0x340] sm:$0xff]  }
 0x151   : > { %4699 = vmatpush3.bf16.msra.mxu0 %v5097_v26  ;;  %3095 = vmatprep.mubr.bf16.mxu0 %v831_v63  ;;  %v5126_v26 = vld [vmem:[%s5452_s22 + $0x2b8] sm:$0xff]   ;;  %v5128_v30 = vld [vmem:[%s5452_s22 + $0x3c0] sm:$0xff]   ;;  %v830_v63 = vpack.c.bf16 %v5575_v23, %v5575_v23  ;;  %v837_v23 = vpack.c.bf16 %v5589_v28, %v5589_v28  ;;  %v5138_v28 = vld [vmem:[%s5452_s22 + $0x390] sm:$0xff]  }
 0x152   : > { %4721 = vmatpush3.bf16.msra.mxu1 %v5098_v36  ;;  %3135 = vmatprep.mubr.bf16.mxu1 %v833_v2  ;;  %v5129_v36 = vld [vmem:[%s5452_s22 + $0x300] sm:$0xff]   ;;  %v5131_v2 = vld [vmem:[%s5452_s22 + $0x348] sm:$0xff]  }
 0x153   : > { %4700 = vmatprep.subr.bf16.mxu0 %v5099_v38  ;;  %4722 = vmatprep.subr.bf16.mxu1 %v5100_v41  ;;  %v5130_v38 = vld [vmem:[%s5452_s22 + $0x380] sm:$0xff]   ;;  %v832_v41 = vpack.c.bf16 %v5579_v24, %v5579_v24  ;;  %v5134_v24 = vld [vmem:[%s5452_s22 + $0x388] sm:$0xff]  }
 0x155   : > { %4701 = vmatpush3.bf16.msra.mxu0 %v5101_v42  ;;  %v835_v42 = vpack.c.bf16 %v5585_v27, %v5585_v27  ;;  %v5136_v27 = vld [vmem:[%s5452_s22 + $0x3d0] sm:$0xff]  }
 0x156   : > { %4723 = vmatpush3.bf16.msra.mxu1 %v5102_v48  ;;  %4702 = vmatprep.subr.bf16.mxu0 %v5103_v49  ;;  %v5132_v48 = vld [vmem:[%s5452_s22 + $0x3c8] sm:$0xff]  }
 0x157   : > { %4724 = vmatprep.subr.bf16.mxu1 %v5104_v52  ;;  %v5133_v49 = vld [vmem:[%s5452_s22 + $0x308] sm:$0xff]   ;;  %v5135_v52 = vld [vmem:[%s5452_s22 + $0x350] sm:$0xff]  }
 0x159   : > { %4703 = vmatpush3.bf16.msra.mxu0 %v5105_v53  ;;  %v5137_v53 = vld [vmem:[%s5452_s22 + $0x310] sm:$0xff]  }
 0x15a   : > { %4725 = vmatpush3.bf16.msra.mxu1 %v5106_v1  ;;  %4704 = vmatprep.subr.bf16.mxu0 %v5107_v3  ;;  %v5139_v1 = vld [vmem:[%s5452_s22 + $0x358] sm:$0xff]  }
 0x15b   : > { %4726 = vmatprep.subr.bf16.mxu1 %v5108_v5  ;;  %v5140_v3 = vld [vmem:[%s5452_s22 + $0x3d8] sm:$0xff]  }
 0x15c   : > { %v5141_v5 = vld [vmem:[%s5452_s22 + $0x318] sm:$0xff]  }
 0x15d   : > { %4705 = vmatpush3.bf16.msra.mxu0 %v5109_v6  ;;  %v5142_v6 = vld [vmem:[%s5452_s22 + $0x398] sm:$0xff]  }
 0x15e   : > { %4727 = vmatpush3.bf16.msra.mxu1 %v5110_v7  ;;  %4706 = vmatprep.subr.bf16.mxu0 %v5111_v8  ;;  %v5143_v7 = vld [vmem:[%s5452_s22 + $0x360] sm:$0xff]  }
 0x15f   : > { %4728 = vmatprep.subr.bf16.mxu1 %v5112_v4  ;;  %v5144_v8 = vld [vmem:[%s5452_s22 + $0x3e0] sm:$0xff]  }
 0x160   : > { %v5145_v4 = vld [vmem:[%s5452_s22 + $0x320] sm:$0xff]  }
 0x161   : > { %4707 = vmatpush3.bf16.msra.mxu0 %v5113_v9  ;;  %v5146_v9 = vld [vmem:[%s5452_s22 + $0x3a0] sm:$0xff]  }
 0x162   : > { %4729 = vmatpush3.bf16.msra.mxu1 %v5114_v10  ;;  %4708 = vmatprep.subr.bf16.mxu0 %v5115_v11  ;;  %v5147_v10 = vld [vmem:[%s5452_s22 + $0x368] sm:$0xff]  }
 0x163   : > { %4730 = vmatprep.subr.bf16.mxu1 %v5116_v12  ;;  %v5148_v11 = vld [vmem:[%s5452_s22 + $0x3e8] sm:$0xff]  }
 0x164   : > { %v5149_v12 = vld [vmem:[%s5452_s22 + $0x328] sm:$0xff]  }
 0x165   : > { %4709 = vmatpush3.bf16.msra.mxu0 %v5117_v13  ;;  %v5150_v13 = vld [vmem:[%s5452_s22 + $0x3a8] sm:$0xff]  }
 0x166   : > { %4731 = vmatpush3.bf16.msra.mxu1 %v5118_v14  ;;  %4710 = vmatprep.subr.bf16.mxu0 %v5119_v15  ;;  %v5151_v14 = vld [vmem:[%s5452_s22 + $0x370] sm:$0xff]  }
 0x167   : > { %4732 = vmatprep.subr.bf16.mxu1 %v5120_v16  ;;  %v5152_v15 = vld [vmem:[%s5452_s22 + $0x3f0] sm:$0xff]  }
 0x168   : > { %v5153_v16 = vld [vmem:[%s5452_s22 + $0x330] sm:$0xff]  }
 0x169   : > { %4711 = vmatpush3.bf16.msra.mxu0 %v5121_v17  ;;  %v5154_v17 = vld [vmem:[%s5452_s22 + $0x3b0] sm:$0xff]  }
 0x16a   : > { %4733 = vmatpush3.bf16.msra.mxu1 %v5122_v18  ;;  %4712 = vmatprep.subr.bf16.mxu0 %v5123_v19  ;;  %v5155_v18 = vld [vmem:[%s5452_s22 + $0x378] sm:$0xff]  }
 0x16b   : > { %4734 = vmatprep.subr.bf16.mxu1 %v5124_v21  ;;  %v5156_v19 = vld [vmem:[%s5452_s22 + $0x3f8] sm:$0xff]  }
 0x16c   : > { %v5157_v21 = vld [vmem:[%s5452_s22 + $0x338] sm:$0xff]  }
 0x16d   : > { %4713 = vmatpush3.bf16.msra.mxu0 %v5125_v25  ;;  %v5158_v25 = vld [vmem:[%s5452_s22 + $0x3b8] sm:$0xff]  }
 0x16e   : > { %4735 = vmatpush3.bf16.msra.mxu1 %v5126_v26  ;;  %4742 = vmatprep.subr.bf16.mxu0 %v5127_v29  ;;  %v5159_v26 = vld [vmem:[%s5452_s22 + $0x440] sm:$0xff]  }
 0x16f   : > { %4764 = vmatprep.subr.bf16.mxu1 %v5128_v30  ;;  %v5160_v29 = vld [vmem:[%s5452_s22 + $0x4c0] sm:$0xff]  }
 0x170   : > { %3096 = vmatmul.mubr.bf16.vlgmr.msra.gmra.mrb[12].mxu0 %v830_v63  ;;  %v5161_v30 = vld [vmem:[%s5452_s22 + $0x400] sm:$0xff]  }
 0x171   : > { %3136 = vmatmul.mubr.bf16.vlgmr.msra.gmra.mrb[12].mxu1 %v832_v41  ;;  %4743 = vmatpush3.bf16.msra.mxu0 %v5129_v36  ;;  %v834_v36 = vpack.c.bf16 %v5595_v31, %v5595_v31  ;;  %v5162_v63 = vld [vmem:[%s5452_s22 + $0x480] sm:$0xff]   ;;  %v5163_v41 = vld [vmem:[%s5452_s22 + $0x448] sm:$0xff]   ;;  %v841_v31 = vpack.c.bf16 %v5605_v34, %v5605_v34  ;;  %v5170_v34 = vld [vmem:[%s5452_s22 + $0x490] sm:$0xff]  }
 0x172   : > { %3175 = vmatprep.mubr.bf16.mxu0 %v835_v42  ;;  %4765 = vmatpush3.bf16.msra.mxu1 %v5130_v38  ;;  %v836_v38 = vpack.c.bf16 %v5599_v32, %v5599_v32  ;;  %v5164_v42 = vld [vmem:[%s5452_s22 + $0x4c8] sm:$0xff]  }
 0x173   : > { %3215 = vmatprep.mubr.bf16.mxu1 %v837_v23  ;;  %4744 = vmatprep.subr.bf16.mxu0 %v5131_v2  ;;  %v839_v2 = vpack.c.bf16 %v5602_v33, %v5602_v33  ;;  %v5166_v32 = vld [vmem:[%s5452_s22 + $0x488] sm:$0xff]   ;;  %v5167_v23 = vld [vmem:[%s5452_s22 + $0x450] sm:$0xff]  }
 0x174   : > { %4766 = vmatprep.subr.bf16.mxu1 %v5132_v48  ;;  %v5165_v48 = vld [vmem:[%s5452_s22 + $0x408] sm:$0xff]   ;;  %v5168_v33 = vld [vmem:[%s5452_s22 + $0x4d0] sm:$0xff]  }
 0x175   : > { %4745 = vmatpush3.bf16.msra.mxu0 %v5133_v49  ;;  %v5169_v49 = vld [vmem:[%s5452_s22 + $0x410] sm:$0xff]  }
 0x176   : > { %4767 = vmatpush3.bf16.msra.mxu1 %v5134_v24  ;;  %4746 = vmatprep.subr.bf16.mxu0 %v5135_v52  ;;  %v5171_v24 = vld [vmem:[%s5452_s22 + $0x458] sm:$0xff]  }
 0x177   : > { %4768 = vmatprep.subr.bf16.mxu1 %v5136_v27  ;;  %v5172_v52 = vld [vmem:[%s5452_s22 + $0x4d8] sm:$0xff]  }
 0x178   : > { %v5173_v27 = vld [vmem:[%s5452_s22 + $0x418] sm:$0xff]  }
 0x179   : > { %4747 = vmatpush3.bf16.msra.mxu0 %v5137_v53  ;;  %v5174_v53 = vld [vmem:[%s5452_s22 + $0x498] sm:$0xff]  }
 0x17a   : > { %4769 = vmatpush3.bf16.msra.mxu1 %v5138_v28  ;;  %4748 = vmatprep.subr.bf16.mxu0 %v5139_v1  ;;  %v5175_v28 = vld [vmem:[%s5452_s22 + $0x460] sm:$0xff]  }
 0x17b   : > { %4770 = vmatprep.subr.bf16.mxu1 %v5140_v3  ;;  %v5176_v1 = vld [vmem:[%s5452_s22 + $0x4e0] sm:$0xff]  }
 0x17c   : > { %v5177_v3 = vld [vmem:[%s5452_s22 + $0x420] sm:$0xff]  }
 0x17d   : > { %4749 = vmatpush3.bf16.msra.mxu0 %v5141_v5  ;;  %v5178_v5 = vld [vmem:[%s5452_s22 + $0x4a0] sm:$0xff]  }
 0x17e   : > { %4771 = vmatpush3.bf16.msra.mxu1 %v5142_v6  ;;  %4750 = vmatprep.subr.bf16.mxu0 %v5143_v7  ;;  %v5179_v6 = vld [vmem:[%s5452_s22 + $0x468] sm:$0xff]  }
 0x17f   : > { %4772 = vmatprep.subr.bf16.mxu1 %v5144_v8  ;;  %v5180_v7 = vld [vmem:[%s5452_s22 + $0x4e8] sm:$0xff]  }
 0x180   : > { %v5181_v8 = vld [vmem:[%s5452_s22 + $0x428] sm:$0xff]  }
 0x181   : > { %4751 = vmatpush3.bf16.msra.mxu0 %v5145_v4  ;;  %v5182_v4 = vld [vmem:[%s5452_s22 + $0x4a8] sm:$0xff]  }
 0x182   : > { %4773 = vmatpush3.bf16.msra.mxu1 %v5146_v9  ;;  %4752 = vmatprep.subr.bf16.mxu0 %v5147_v10  ;;  %v5183_v9 = vld [vmem:[%s5452_s22 + $0x470] sm:$0xff]  }
 0x183   : > { %4774 = vmatprep.subr.bf16.mxu1 %v5148_v11  ;;  %v5184_v10 = vld [vmem:[%s5452_s22 + $0x4f0] sm:$0xff]  }
 0x184   : > { %v5185_v11 = vld [vmem:[%s5452_s22 + $0x430] sm:$0xff]  }
 0x185   : > { %4753 = vmatpush3.bf16.msra.mxu0 %v5149_v12  ;;  %v5186_v12 = vld [vmem:[%s5452_s22 + $0x4b0] sm:$0xff]  }
 0x186   : > { %4775 = vmatpush3.bf16.msra.mxu1 %v5150_v13  ;;  %4754 = vmatprep.subr.bf16.mxu0 %v5151_v14  ;;  %v5187_v13 = vld [vmem:[%s5452_s22 + $0x478] sm:$0xff]  }
 0x187   : > { %4776 = vmatprep.subr.bf16.mxu1 %v5152_v15  ;;  %v5188_v14 = vld [vmem:[%s5452_s22 + $0x4f8] sm:$0xff]  }
 0x188   : > { %v5189_v15 = vld [vmem:[%s5452_s22 + $0x438] sm:$0xff]  }
 0x189   : > { %4755 = vmatpush3.bf16.msra.mxu0 %v5153_v16  ;;  %v5190_v16 = vld [vmem:[%s5452_s22 + $0x4b8] sm:$0xff]  }
 0x18a   : > { %4777 = vmatpush3.bf16.msra.mxu1 %v5154_v17  ;;  %4756 = vmatprep.subr.bf16.mxu0 %v5155_v18  ;;  %v5191_v17 = vld [vmem:[%s5452_s22 + $0x540] sm:$0xff]  }
 0x18b   : > { %4778 = vmatprep.subr.bf16.mxu1 %v5156_v19  ;;  %v5192_v18 = vld [vmem:[%s5452_s22 + $0x5c0] sm:$0xff]  }
 0x18c   : > { %v5193_v19 = vld [vmem:[%s5452_s22 + $0x500] sm:$0xff]  }
 0x18d   : > { %4757 = vmatpush3.bf16.msra.mxu0 %v5157_v21  ;;  %v838_v21 = vpack.c.bf16 %v5608_v35, %v5608_v35  ;;  %v845_v35 = vpack.c.bf16 %v5621_v43, %v5621_v43  ;;  %v5202_v43 = vld [vmem:[%s5452_s22 + $0x590] sm:$0xff]  }
 0x18e   : > { %4779 = vmatpush3.bf16.msra.mxu1 %v5158_v25  ;;  %4786 = vmatprep.subr.bf16.mxu0 %v5159_v26  ;;  %v5194_v25 = vld [vmem:[%s5452_s22 + $0x580] sm:$0xff]   ;;  %v840_v26 = vpack.c.bf16 %v5613_v39, %v5613_v39  ;;  %v5198_v39 = vld [vmem:[%s5452_s22 + $0x588] sm:$0xff]  }
 0x18f   : > { %4808 = vmatprep.subr.bf16.mxu1 %v5160_v29  ;;  %v5195_v29 = vld [vmem:[%s5452_s22 + $0x548] sm:$0xff]  }
 0x190   : > { %3176 = vmatmul.mubr.bf16.vlgmr.msra.gmra.mrb[16].mxu0 %v834_v36  ;;  %v5196_v36 = vld [vmem:[%s5452_s22 + $0x5c8] sm:$0xff]  }
 0x191   : > { %3216 = vmatmul.mubr.bf16.vlgmr.msra.gmra.mrb[16].mxu1 %v836_v38  ;;  %4787 = vmatpush3.bf16.msra.mxu0 %v5161_v30  ;;  %v843_v30 = vpack.c.bf16 %v5616_v40, %v5616_v40  ;;  %v5199_v38 = vld [vmem:[%s5452_s22 + $0x550] sm:$0xff]  }
 0x192   : > { %3255 = vmatprep.mubr.bf16.mxu0 %v839_v2  ;;  %4809 = vmatpush3.bf16.msra.mxu1 %v5162_v63  ;;  %v5197_v63 = vld [vmem:[%s5452_s22 + $0x508] sm:$0xff]   ;;  %v5200_v40 = vld [vmem:[%s5452_s22 + $0x5d0] sm:$0xff]   ;;  %v5203_v2 = vld [vmem:[%s5452_s22 + $0x558] sm:$0xff]  }
 0x193   : > { %3295 = vmatprep.mubr.bf16.mxu1 %v841_v31  ;;  %4788 = vmatprep.subr.bf16.mxu0 %v5163_v41  ;;  %v5201_v41 = vld [vmem:[%s5452_s22 + $0x510] sm:$0xff]   ;;  %v5205_v31 = vld [vmem:[%s5452_s22 + $0x518] sm:$0xff]  }
 0x194   : > { %4810 = vmatprep.subr.bf16.mxu1 %v5164_v42  ;;  %v5204_v42 = vld [vmem:[%s5452_s22 + $0x5d8] sm:$0xff]  }
 0x195   : > { %4789 = vmatpush3.bf16.msra.mxu0 %v5165_v48  ;;  %v5206_v48 = vld [vmem:[%s5452_s22 + $0x598] sm:$0xff]  }
 0x196   : > { %4811 = vmatpush3.bf16.msra.mxu1 %v5166_v32  ;;  %4790 = vmatprep.subr.bf16.mxu0 %v5167_v23  ;;  %v5207_v32 = vld [vmem:[%s5452_s22 + $0x560] sm:$0xff]  }
 0x197   : > { %4812 = vmatprep.subr.bf16.mxu1 %v5168_v33  ;;  %v5208_v23 = vld [vmem:[%s5452_s22 + $0x5e0] sm:$0xff]  }
 0x198   : > { %v5209_v33 = vld [vmem:[%s5452_s22 + $0x520] sm:$0xff]  }
 0x199   : > { %4791 = vmatpush3.bf16.msra.mxu0 %v5169_v49  ;;  %v5210_v49 = vld [vmem:[%s5452_s22 + $0x5a0] sm:$0xff]  }
 0x19a   : > { %4813 = vmatpush3.bf16.msra.mxu1 %v5170_v34  ;;  %4792 = vmatprep.subr.bf16.mxu0 %v5171_v24  ;;  %v5211_v34 = vld [vmem:[%s5452_s22 + $0x568] sm:$0xff]  }
 0x19b   : > { %4814 = vmatprep.subr.bf16.mxu1 %v5172_v52  ;;  %v5212_v24 = vld [vmem:[%s5452_s22 + $0x5e8] sm:$0xff]  }
 0x19c   : > { %v5213_v52 = vld [vmem:[%s5452_s22 + $0x528] sm:$0xff]  }
 0x19d   : > { %4793 = vmatpush3.bf16.msra.mxu0 %v5173_v27  ;;  %v5214_v27 = vld [vmem:[%s5452_s22 + $0x5a8] sm:$0xff]  }
 0x19e   : > { %4815 = vmatpush3.bf16.msra.mxu1 %v5174_v53  ;;  %4794 = vmatprep.subr.bf16.mxu0 %v5175_v28  ;;  %v5215_v53 = vld [vmem:[%s5452_s22 + $0x570] sm:$0xff]  }
 0x19f   : > { %4816 = vmatprep.subr.bf16.mxu1 %v5176_v1  ;;  %v5216_v28 = vld [vmem:[%s5452_s22 + $0x5f0] sm:$0xff]  }
 0x1a0   : > { %v5217_v1 = vld [vmem:[%s5452_s22 + $0x530] sm:$0xff]  }
 0x1a1   : > { %4795 = vmatpush3.bf16.msra.mxu0 %v5177_v3  ;;  %v5218_v3 = vld [vmem:[%s5452_s22 + $0x5b0] sm:$0xff]  }
 0x1a2   : > { %4817 = vmatpush3.bf16.msra.mxu1 %v5178_v5  ;;  %4796 = vmatprep.subr.bf16.mxu0 %v5179_v6  ;;  %v5219_v5 = vld [vmem:[%s5452_s22 + $0x578] sm:$0xff]  }
 0x1a3   : > { %4818 = vmatprep.subr.bf16.mxu1 %v5180_v7  ;;  %v5220_v6 = vld [vmem:[%s5452_s22 + $0x5f8] sm:$0xff]  }
 0x1a4   : > { %v5221_v7 = vld [vmem:[%s5452_s22 + $0x538] sm:$0xff]  }
 0x1a5   : > { %4797 = vmatpush3.bf16.msra.mxu0 %v5181_v8  ;;  %v5222_v8 = vld [vmem:[%s5452_s22 + $0x5b8] sm:$0xff]  }
 0x1a6   : > { %4819 = vmatpush3.bf16.msra.mxu1 %v5182_v4  ;;  %4798 = vmatprep.subr.bf16.mxu0 %v5183_v9  ;;  %v5223_v4 = vld [vmem:[%s5452_s22 + $0x640] sm:$0xff]  }
 0x1a7   : > { %4820 = vmatprep.subr.bf16.mxu1 %v5184_v10  ;;  %v5224_v9 = vld [vmem:[%s5452_s22 + $0x6c0] sm:$0xff]  }
 0x1a8   : > { %v5225_v10 = vld [vmem:[%s5452_s22 + $0x600] sm:$0xff]  }
 0x1a9   : > { %4799 = vmatpush3.bf16.msra.mxu0 %v5185_v11  ;;  %v842_v11 = vpack.c.bf16 %v5624_v44, %v5624_v44  ;;  %v849_v44 = vpack.c.bf16 %v5635_v47, %v5635_v47  ;;  %v5234_v47 = vld [vmem:[%s5452_s22 + $0x690] sm:$0xff]  }
 0x1aa   : > { %4821 = vmatpush3.bf16.msra.mxu1 %v5186_v12  ;;  %4800 = vmatprep.subr.bf16.mxu0 %v5187_v13  ;;  %v5226_v12 = vld [vmem:[%s5452_s22 + $0x680] sm:$0xff]   ;;  %v844_v13 = vpack.c.bf16 %v5627_v45, %v5627_v45  ;;  %v5230_v45 = vld [vmem:[%s5452_s22 + $0x688] sm:$0xff]  }
 0x1ab   : > { %4822 = vmatprep.subr.bf16.mxu1 %v5188_v14  ;;  %v5227_v14 = vld [vmem:[%s5452_s22 + $0x648] sm:$0xff]  }
 0x1ad   : > { %4801 = vmatpush3.bf16.msra.mxu0 %v5189_v15  ;;  %v847_v15 = vpack.c.bf16 %v5631_v46, %v5631_v46  ;;  %v5232_v46 = vld [vmem:[%s5452_s22 + $0x6d0] sm:$0xff]  }
 0x1ae   : > { %4823 = vmatpush3.bf16.msra.mxu1 %v5190_v16  ;;  %4830 = vmatprep.subr.bf16.mxu0 %v5191_v17  ;;  %v5228_v16 = vld [vmem:[%s5452_s22 + $0x6c8] sm:$0xff]  }
 0x1af   : > { %4852 = vmatprep.subr.bf16.mxu1 %v5192_v18  ;;  %v5229_v17 = vld [vmem:[%s5452_s22 + $0x608] sm:$0xff]   ;;  %v5231_v18 = vld [vmem:[%s5452_s22 + $0x650] sm:$0xff]  }
 0x1b0   : > { %3256 = vmatmul.mubr.bf16.vlgmr.msra.gmra.mrb[20].mxu0 %v838_v21  ;;  %v5235_v21 = vld [vmem:[%s5452_s22 + $0x658] sm:$0xff]  }
 0x1b1   : > { %3296 = vmatmul.mubr.bf16.vlgmr.msra.gmra.mrb[20].mxu1 %v840_v26  ;;  %4831 = vmatpush3.bf16.msra.mxu0 %v5193_v19  ;;  %v5233_v19 = vld [vmem:[%s5452_s22 + $0x610] sm:$0xff]   ;;  %v5237_v26 = vld [vmem:[%s5452_s22 + $0x618] sm:$0xff]  }
 0x1b2   : > { %3335 = vmatprep.mubr.bf16.mxu0 %v843_v30  ;;  %4853 = vmatpush3.bf16.msra.mxu1 %v5194_v25  ;;  %v5236_v25 = vld [vmem:[%s5452_s22 + $0x6d8] sm:$0xff]   ;;  %v5239_v30 = vld [vmem:[%s5452_s22 + $0x660] sm:$0xff]  }
 0x1b3   : > { %3375 = vmatprep.mubr.bf16.mxu1 %v845_v35  ;;  %4832 = vmatprep.subr.bf16.mxu0 %v5195_v29  ;;  %v5238_v29 = vld [vmem:[%s5452_s22 + $0x698] sm:$0xff]   ;;  %v5241_v35 = vld [vmem:[%s5452_s22 + $0x620] sm:$0xff]  }
 0x1b4   : > { %4854 = vmatprep.subr.bf16.mxu1 %v5196_v36  ;;  %v5240_v36 = vld [vmem:[%s5452_s22 + $0x6e0] sm:$0xff]  }
 0x1b5   : > { %4833 = vmatpush3.bf16.msra.mxu0 %v5197_v63  ;;  %v5242_v63 = vld [vmem:[%s5452_s22 + $0x6a0] sm:$0xff]  }
 0x1b6   : > { %4855 = vmatpush3.bf16.msra.mxu1 %v5198_v39  ;;  %4834 = vmatprep.subr.bf16.mxu0 %v5199_v38  ;;  %v5243_v39 = vld [vmem:[%s5452_s22 + $0x668] sm:$0xff]  }
 0x1b7   : > { %4856 = vmatprep.subr.bf16.mxu1 %v5200_v40  ;;  %v5244_v38 = vld [vmem:[%s5452_s22 + $0x6e8] sm:$0xff]  }
 0x1b8   : > { %v5245_v40 = vld [vmem:[%s5452_s22 + $0x628] sm:$0xff]  }
 0x1b9   : > { %4835 = vmatpush3.bf16.msra.mxu0 %v5201_v41  ;;  %v5246_v41 = vld [vmem:[%s5452_s22 + $0x6a8] sm:$0xff]  }
 0x1ba   : > { %4857 = vmatpush3.bf16.msra.mxu1 %v5202_v43  ;;  %4836 = vmatprep.subr.bf16.mxu0 %v5203_v2  ;;  %v5247_v43 = vld [vmem:[%s5452_s22 + $0x670] sm:$0xff]  }
 0x1bb   : > { %4858 = vmatprep.subr.bf16.mxu1 %v5204_v42  ;;  %v5248_v2 = vld [vmem:[%s5452_s22 + $0x6f0] sm:$0xff]  }
 0x1bc   : > { %v5249_v42 = vld [vmem:[%s5452_s22 + $0x630] sm:$0xff]  }
 0x1bd   : > { %4837 = vmatpush3.bf16.msra.mxu0 %v5205_v31  ;;  %v5250_v31 = vld [vmem:[%s5452_s22 + $0x6b0] sm:$0xff]  }
 0x1be   : > { %4859 = vmatpush3.bf16.msra.mxu1 %v5206_v48  ;;  %4838 = vmatprep.subr.bf16.mxu0 %v5207_v32  ;;  %v5251_v48 = vld [vmem:[%s5452_s22 + $0x678] sm:$0xff]  }
 0x1bf   : > { %4860 = vmatprep.subr.bf16.mxu1 %v5208_v23  ;;  %v5252_v32 = vld [vmem:[%s5452_s22 + $0x6f8] sm:$0xff]  }
 0x1c0   : > { %v5253_v23 = vld [vmem:[%s5452_s22 + $0x638] sm:$0xff]  }
 0x1c1   : > { %4839 = vmatpush3.bf16.msra.mxu0 %v5209_v33  ;;  %v5254_v33 = vld [vmem:[%s5452_s22 + $0x6b8] sm:$0xff]  }
 0x1c2   : > { %4861 = vmatpush3.bf16.msra.mxu1 %v5210_v49  ;;  %4840 = vmatprep.subr.bf16.mxu0 %v5211_v34  ;;  %v5255_v49 = vld [vmem:[%s5452_s22 + $0x740] sm:$0xff]  }
 0x1c3   : > { %4862 = vmatprep.subr.bf16.mxu1 %v5212_v24  ;;  %v5256_v34 = vld [vmem:[%s5452_s22 + $0x7c0] sm:$0xff]  }
 0x1c4   : > { %v5257_v24 = vld [vmem:[%s5452_s22 + $0x700] sm:$0xff]  }
 0x1c5   : > { %4841 = vmatpush3.bf16.msra.mxu0 %v5213_v52  ;;  %v846_v52 = vpack.c.bf16 %v5641_v50, %v5641_v50  ;;  %v853_v50 = vpack.c.bf16 %v5655_v56, %v5655_v56  ;;  %v5266_v56 = vld [vmem:[%s5452_s22 + $0x790] sm:$0xff]  }
 0x1c6   : > { %4863 = vmatpush3.bf16.msra.mxu1 %v5214_v27  ;;  %4842 = vmatprep.subr.bf16.mxu0 %v5215_v53  ;;  %v5258_v27 = vld [vmem:[%s5452_s22 + $0x780] sm:$0xff]   ;;  %v848_v53 = vpack.c.bf16 %v5645_v51, %v5645_v51  ;;  %v5262_v51 = vld [vmem:[%s5452_s22 + $0x788] sm:$0xff]  }
 0x1c7   : > { %4864 = vmatprep.subr.bf16.mxu1 %v5216_v28  ;;  %v5259_v28 = vld [vmem:[%s5452_s22 + $0x748] sm:$0xff]  }
 0x1c9   : > { %4843 = vmatpush3.bf16.msra.mxu0 %v5217_v1  ;;  %v851_v1 = vpack.c.bf16 %v5651_v55, %v5651_v55  ;;  %v5264_v55 = vld [vmem:[%s5452_s22 + $0x7d0] sm:$0xff]  }
 0x1ca   : > { %4865 = vmatpush3.bf16.msra.mxu1 %v5218_v3  ;;  %4844 = vmatprep.subr.bf16.mxu0 %v5219_v5  ;;  %v5260_v3 = vld [vmem:[%s5452_s22 + $0x7c8] sm:$0xff]  }
 0x1cb   : > { %4866 = vmatprep.subr.bf16.mxu1 %v5220_v6  ;;  %v5261_v5 = vld [vmem:[%s5452_s22 + $0x708] sm:$0xff]   ;;  %v5263_v6 = vld [vmem:[%s5452_s22 + $0x750] sm:$0xff]  }
 0x1cd   : > { %4845 = vmatpush3.bf16.msra.mxu0 %v5221_v7  ;;  %v5265_v7 = vld [vmem:[%s5452_s22 + $0x710] sm:$0xff]  }
 0x1ce   : > { %4867 = vmatpush3.bf16.msra.mxu1 %v5222_v8  ;;  %4874 = vmatprep.subr.bf16.mxu0 %v5223_v4  ;;  %v5267_v8 = vld [vmem:[%s5452_s22 + $0x758] sm:$0xff]  }
 0x1cf   : > { %4896 = vmatprep.subr.bf16.mxu1 %v5224_v9  ;;  %v5268_v4 = vld [vmem:[%s5452_s22 + $0x7d8] sm:$0xff]  }
 0x1d0   : > { %3336 = vmatmul.mubr.bf16.vlgmr.msra.gmra.mrb[24].mxu0 %v842_v11  ;;  %v5269_v9 = vld [vmem:[%s5452_s22 + $0x718] sm:$0xff]   ;;  %v5271_v11 = vld [vmem:[%s5452_s22 + $0x760] sm:$0xff]  }
 0x1d1   : > { %3376 = vmatmul.mubr.bf16.vlgmr.msra.gmra.mrb[24].mxu1 %v844_v13  ;;  %4875 = vmatpush3.bf16.msra.mxu0 %v5225_v10  ;;  %v5270_v10 = vld [vmem:[%s5452_s22 + $0x798] sm:$0xff]   ;;  %v5273_v13 = vld [vmem:[%s5452_s22 + $0x720] sm:$0xff]  }
 0x1d2   : > { %3415 = vmatprep.mubr.bf16.mxu0 %v847_v15  ;;  %4897 = vmatpush3.bf16.msra.mxu1 %v5226_v12  ;;  %v5272_v12 = vld [vmem:[%s5452_s22 + $0x7e0] sm:$0xff]   ;;  %v5275_v15 = vld [vmem:[%s5452_s22 + $0x768] sm:$0xff]  }
 0x1d3   : > { %3455 = vmatprep.mubr.bf16.mxu1 %v849_v44  ;;  %4876 = vmatprep.subr.bf16.mxu0 %v5227_v14  ;;  %v5274_v14 = vld [vmem:[%s5452_s22 + $0x7a0] sm:$0xff]   ;;  %v5277_v44 = vld [vmem:[%s5452_s22 + $0x728] sm:$0xff]  }
 0x1d4   : > { %4898 = vmatprep.subr.bf16.mxu1 %v5228_v16  ;;  %v5276_v16 = vld [vmem:[%s5452_s22 + $0x7e8] sm:$0xff]  }
 0x1d5   : > { %4877 = vmatpush3.bf16.msra.mxu0 %v5229_v17  ;;  %v5278_v17 = vld [vmem:[%s5452_s22 + $0x7a8] sm:$0xff]  }
 0x1d6   : > { %4899 = vmatpush3.bf16.msra.mxu1 %v5230_v45  ;;  %4878 = vmatprep.subr.bf16.mxu0 %v5231_v18  ;;  %v5279_v45 = vld [vmem:[%s5452_s22 + $0x770] sm:$0xff]  }
 0x1d7   : > { %4900 = vmatprep.subr.bf16.mxu1 %v5232_v46 }
 0x1d9   : > { %4879 = vmatpush3.bf16.msra.mxu0 %v5233_v19  ;;  %v5280_v19 = vld [vmem:[%s5452_s22 + $0x7f0] sm:$0xff]  }
 0x1da   : > { %4901 = vmatpush3.bf16.msra.mxu1 %v5234_v47  ;;  %4880 = vmatprep.subr.bf16.mxu0 %v5235_v21 }
 0x1db   : > { %4902 = vmatprep.subr.bf16.mxu1 %v5236_v25 }
 0x1dd   : > { %4881 = vmatpush3.bf16.msra.mxu0 %v5237_v26 }
 0x1de   : > { %4903 = vmatpush3.bf16.msra.mxu1 %v5238_v29  ;;  %4882 = vmatprep.subr.bf16.mxu0 %v5239_v30 }
 0x1df   : > { %4904 = vmatprep.subr.bf16.mxu1 %v5240_v36  ;;  %v5281_v36 = vld [vmem:[%s5452_s22 + $0x730] sm:$0xff]  }
 0x1e1   : > { %4883 = vmatpush3.bf16.msra.mxu0 %v5241_v35 }
 0x1e2   : > { %4905 = vmatpush3.bf16.msra.mxu1 %v5242_v63  ;;  %4884 = vmatprep.subr.bf16.mxu0 %v5243_v39  ;;  %v5282_v39 = vld [vmem:[%s5452_s22 + $0x7b0] sm:$0xff]  }
 0x1e3   : > { %4906 = vmatprep.subr.bf16.mxu1 %v5244_v38  ;;  %v5283_v38 = vld [vmem:[%s5452_s22 + $0x778] sm:$0xff]  }
 0x1e5   : > { %4885 = vmatpush3.bf16.msra.mxu0 %v5245_v40 }
 0x1e6   : > { %4907 = vmatpush3.bf16.msra.mxu1 %v5246_v41  ;;  %4886 = vmatprep.subr.bf16.mxu0 %v5247_v43  ;;  %v5284_v41 = vld [vmem:[%s5452_s22 + $0x7f8] sm:$0xff]  }
 0x1e7   : > { %4908 = vmatprep.subr.bf16.mxu1 %v5248_v2  ;;  %v5285_v43 = vld [vmem:[%s5452_s22 + $0x738] sm:$0xff]  }
 0x1e8   : > { %v5286_v2 = vld [vmem:[%s5452_s22 + $0x7b8] sm:$0xff]  }
 0x1e9   : > { %4887 = vmatpush3.bf16.msra.mxu0 %v5249_v42  ;;  %v850_v42 = vpack.c.bf16 %v5659_v57, %v5659_v57 }
 0x1ea   : > { %4909 = vmatpush3.bf16.msra.mxu1 %v5250_v31  ;;  %4888 = vmatprep.subr.bf16.mxu0 %v5251_v48  ;;  %v852_v31 = vpack.c.bf16 %v5663_v0, %v5663_v0 }
 0x1eb   : > { %4910 = vmatprep.subr.bf16.mxu1 %v5252_v32 }
 0x1ed   : > { %4889 = vmatpush3.bf16.msra.mxu0 %v5253_v23 }
 0x1ee   : > { %4911 = vmatpush3.bf16.msra.mxu1 %v5254_v33  ;;  %4918 = vmatprep.subr.bf16.mxu0 %v5255_v49 }
 0x1ef   : > { %4940 = vmatprep.subr.bf16.mxu1 %v5256_v34 }
 0x1f0   : > { %3416 = vmatmul.mubr.bf16.vlgmr.msra.gmra.mrb[28].mxu0 %v846_v52 }
 0x1f1   : > { %3456 = vmatmul.mubr.bf16.vlgmr.msra.gmra.mrb[28].mxu1 %v848_v53  ;;  %4919 = vmatpush3.bf16.msra.mxu0 %v5257_v24 }
 0x1f2   : > { %3495 = vmatprep.mubr.bf16.mxu0 %v851_v1  ;;  %4941 = vmatpush3.bf16.msra.mxu1 %v5258_v27 }
 0x1f3   : > { %3535 = vmatprep.mubr.bf16.mxu1 %v853_v50  ;;  %4920 = vmatprep.subr.bf16.mxu0 %v5259_v28 }
 0x1f4   : > { %4942 = vmatprep.subr.bf16.mxu1 %v5260_v3 }
 0x1f5   : > { %4921 = vmatpush3.bf16.msra.mxu0 %v5261_v5 }
 0x1f6   : > { %4943 = vmatpush3.bf16.msra.mxu1 %v5262_v51  ;;  %4922 = vmatprep.subr.bf16.mxu0 %v5263_v6 }
 0x1f7   : > { %4944 = vmatprep.subr.bf16.mxu1 %v5264_v55 }
 0x1f9   : > { %4923 = vmatpush3.bf16.msra.mxu0 %v5265_v7 }
 0x1fa   : > { %4945 = vmatpush3.bf16.msra.mxu1 %v5266_v56  ;;  %4924 = vmatprep.subr.bf16.mxu0 %v5267_v8 }
 0x1fb   : > { %4946 = vmatprep.subr.bf16.mxu1 %v5268_v4 }
 0x1fd   : > { %4925 = vmatpush3.bf16.msra.mxu0 %v5269_v9 }
 0x1fe   : > { %4947 = vmatpush3.bf16.msra.mxu1 %v5270_v10  ;;  %4926 = vmatprep.subr.bf16.mxu0 %v5271_v11 }
 0x1ff   : > { %4948 = vmatprep.subr.bf16.mxu1 %v5272_v12 }
 0x201   : > { %4927 = vmatpush3.bf16.msra.mxu0 %v5273_v13 }
 0x202   : > { %4949 = vmatpush3.bf16.msra.mxu1 %v5274_v14  ;;  %4928 = vmatprep.subr.bf16.mxu0 %v5275_v15 }
 0x203   : > { %v4626_v18 = vpop.f32.mrb[4].mxu0  ;;  %v4648_v46 = vpop.f32.mrb[4].mxu1  ;;  %4950 = vmatprep.subr.bf16.mxu1 %v5276_v16 }
 0x204   : > { %v4627_v47 = vpop.f32.mrb[5].mxu0  ;;  %v4649_v21 = vpop.f32.mrb[5].mxu1 }
 0x205   : > { %v4628_v25 = vadd.f32 %v4627_v47, %v4626_v18  ;;  %v4650_v26 = vadd.f32 %v4649_v21, %v4648_v46  ;;  %4929 = vmatpush3.bf16.msra.mxu0 %v5277_v44  ;;  %v4629_v29 = vpop.f32.mrb[6].mxu0  ;;  %v4651_v30 = vpop.f32.mrb[6].mxu1 }
 0x206   : > { %4951 = vmatpush3.bf16.msra.mxu1 %v5278_v17  ;;  %v4630_v35 = vpop.f32.mrb[7].mxu0  ;;  %v4652_v63 = vpop.f32.mrb[7].mxu1  ;;  %4930 = vmatprep.subr.bf16.mxu0 %v5279_v45 }
 0x207   : > { %v2978_v40 = vadd.f32 %v4650_v26, %v4628_v25  ;;  %4952 = vmatprep.subr.bf16.mxu1 %v5280_v19 }
 0x209   : > { %4931 = vmatpush3.bf16.msra.mxu0 %v5281_v36 }
 0x20a   : > { %4953 = vmatpush3.bf16.msra.mxu1 %v5282_v39  ;;  %4932 = vmatprep.subr.bf16.mxu0 %v5283_v38 }
 0x20b   : > { %4954 = vmatprep.subr.bf16.mxu1 %v5284_v41 }
 0x20d   : > { %4933 = vmatpush3.bf16.msra.mxu0 %v5285_v43 }
 0x20e   : > { %4955 = vmatpush3.bf16.msra.mxu1 %v5286_v2 }
 0x210   : > { %3496 = vmatmul.mubr.bf16.vlgmr.msra.gmra.mrb[32].mxu0 %v850_v42 }
 0x211   : > { %3536 = vmatmul.mubr.bf16.vlgmr.msra.gmra.mrb[32].mxu1 %v852_v31 }
 0x223   : > { %v4670_v48 = vpop.f32.mrb[8].mxu0  ;;  %v4692_v32 = vpop.f32.mrb[8].mxu1 }
 0x224   : > { %v4671_v23 = vpop.f32.mrb[9].mxu0  ;;  %v4693_v33 = vpop.f32.mrb[9].mxu1 }
 0x225   : > { %v4672_v49 = vadd.f32 %v4671_v23, %v4670_v48  ;;  %v4694_v34 = vadd.f32 %v4693_v33, %v4692_v32  ;;  %v4673_v24 = vpop.f32.mrb[10].mxu0  ;;  %v4695_v52 = vpop.f32.mrb[10].mxu1 }
 0x226   : > { %v4674_v27 = vpop.f32.mrb[11].mxu0  ;;  %v4696_v53 = vpop.f32.mrb[11].mxu1 }
 0x227   : > { %v3018_v28 = vadd.f32 %v4672_v49, %v2978_v40 }
 0x229   : > { %v3058_v1 = vadd.f32 %v4694_v34, %v3018_v28 }
 0x243   : > { %v4714_v3 = vpop.f32.mrb[12].mxu0 }
 0x244   : > { %v4736_v50 = vpop.f32.mrb[12].mxu1  ;;  %v4715_v57 = vpop.f32.mrb[13].mxu0 }
 0x245   : > { %v4716_v5 = vadd.f32 %v4715_v57, %v4714_v3  ;;  %v4737_v51 = vpop.f32.mrb[13].mxu1  ;;  %v4717_v0 = vpop.f32.mrb[14].mxu0 }
 0x246   : > { %v4738_v6 = vadd.f32 %v4737_v51, %v4736_v50  ;;  %v4739_v55 = vpop.f32.mrb[14].mxu1  ;;  %v4718_v7 = vpop.f32.mrb[15].mxu0 }
 0x247   : > { %v3098_v56 = vadd.f32 %v4716_v5, %v3058_v1  ;;  %v4740_v8 = vpop.f32.mrb[15].mxu1 }
 0x249   : > { %v3138_v4 = vadd.f32 %v4738_v6, %v3098_v56 }
 0x263   : > { %v4758_v9 = vpop.f32.mrb[16].mxu0 }
 0x264   : > { %v4780_v10 = vpop.f32.mrb[16].mxu1  ;;  %v4759_v11 = vpop.f32.mrb[17].mxu0 }
 0x265   : > { %v4760_v12 = vadd.f32 %v4759_v11, %v4758_v9  ;;  %v4781_v13 = vpop.f32.mrb[17].mxu1  ;;  %v4761_v14 = vpop.f32.mrb[18].mxu0 }
 0x266   : > { %v4782_v15 = vadd.f32 %v4781_v13, %v4780_v10  ;;  %v4783_v16 = vpop.f32.mrb[18].mxu1  ;;  %v4762_v44 = vpop.f32.mrb[19].mxu0  ;;  %v854_v13 = vld [vmem:[#allocation2] sm:$0x1] }
 0x267   : > { %v3178_v17 = vadd.f32 %v4760_v12, %v3138_v4  ;;  %v4784_v45 = vpop.f32.mrb[19].mxu1  ;;  %v3554_v16 = vld [vmem:[%s6159_s5] sm:$0xff] (!%p4541_p10) }
 0x268   : > { %v3558_v44 = vld [vmem:[%s6159_s5 + $0x20] sm:$0xff] (!%p4541_p10) }
 0x269   : > { %v3218_v18 = vadd.f32 %v4782_v15, %v3178_v17  ;;  %v3555_v17 = vld [vmem:[%s6159_s5 + $0x8] sm:$0xff] (!%p4541_p10)  ;;  %v4543_v45 = vcombine.high (!%p4541_p10), %v3554_v16, %v3558_v44 }
 0x26b   : > { %3980 = vmatprep.subr.bf16.mxu0 (!%p4541_p10), %v4543_v45  ;;  %v3614_v45 = vld [vmem:[%s6159_s5 + $0x1e0] sm:$0xff] (!%p4541_p10) }
 0x283   : > { %v4802_v46 = vpop.f32.mrb[20].mxu0 }
 0x284   : > { %v4824_v19 = vpop.f32.mrb[20].mxu1  ;;  %v4803_v47 = vpop.f32.mrb[21].mxu0 }
 0x285   : > { %v4804_v21 = vadd.f32 %v4803_v47, %v4802_v46  ;;  %v4825_v25 = vpop.f32.mrb[21].mxu1  ;;  %v4805_v26 = vpop.f32.mrb[22].mxu0  ;;  %v4542_v46 = vcombine.low (!%p4541_p10), %v3554_v16, %v3558_v44  ;;  %v3566_v47 = vld [vmem:[%s6159_s5 + $0x60] sm:$0xff] (!%p4541_p10) }
 0x286   : > { %v4826_v29 = vadd.f32 %v4825_v25, %v4824_v19  ;;  %v4827_v30 = vpop.f32.mrb[22].mxu1  ;;  %v4806_v36 = vpop.f32.mrb[23].mxu0  ;;  %v3562_v19 = vld [vmem:[%s6159_s5 + $0x40] sm:$0xff] (!%p4541_p10) }
 0x287   : > { %v3258_v35 = vadd.f32 %v4804_v21, %v3218_v18  ;;  %v4828_v63 = vpop.f32.mrb[23].mxu1  ;;  %v3559_v18 = vld [vmem:[%s6159_s5 + $0x28] sm:$0xff] (!%p4541_p10)  ;;  %v5314_v21 = vmov (!%p4541_p10), 0   ;;  %3981 = vmatpush1.bf16.msra.mxu0 (!%p4541_p10), %v4542_v46 }
 0x288   : > { %4012 = vmatprep.mubr.bf16.mxu0 (!%p4541_p10), %v5314_v21  ;;  %4053 = vmatprep.mubr.bf16.mxu1 (!%p4541_p10), %v5314_v21  ;;  %v4545_v25 = vcombine.high (!%p4541_p10), %v3555_v17, %v3559_v18  ;;  %v4544_v26 = vcombine.low (!%p4541_p10), %v3555_v17, %v3559_v18  ;;  %v3563_v30 = vld [vmem:[%s6159_s5 + $0x48] sm:$0xff] (!%p4541_p10)  ;;  %v3610_v17 = vld [vmem:[%s6159_s5 + $0x1c0] sm:$0xff] (!%p4541_p10) }
 0x289   : > { %v3298_v39 = vadd.f32 %v4826_v29, %v3258_v35  ;;  %v4551_v29 = vcombine.high (!%p4541_p10), %v3562_v19, %v3566_v47  ;;  %v3567_v36 = vld [vmem:[%s6159_s5 + $0x68] sm:$0xff] (!%p4541_p10)  ;;  %v3570_v35 = vld [vmem:[%s6159_s5 + $0x80] sm:$0xff] (!%p4541_p10) }
 0x28a   : > { %v4553_v63 = vcombine.high (!%p4541_p10), %v3563_v30, %v3567_v36  ;;  %4021 = vmatprep.subr.bf16.mxu1 (!%p4541_p10), %v4545_v25  ;;  %v3611_v18 = vld [vmem:[%s6159_s5 + $0x1c8] sm:$0xff] (!%p4541_p10) }
 0x28b   : > { %4022 = vmatpush1.bf16.msra.mxu1 (!%p4541_p10), %v4544_v26  ;;  %3982 = vmatprep.subr.bf16.mxu0 (!%p4541_p10), %v4551_v29  ;;  %v3615_v46 = vld [vmem:[%s6159_s5 + $0x1e8] sm:$0xff] (!%p4541_p10)  ;;  %v4599_v26 = vcombine.high (!%p4541_p10), %v3610_v17, %v3614_v45 }
 0x28c   : > { %4023 = vmatprep.subr.bf16.mxu1 (!%p4541_p10), %v4553_v63  ;;  %v4601_v29 = vcombine.high (!%p4541_p10), %v3611_v18, %v3615_v46  ;;  %v3557_v63 = vld [vmem:[%s6159_s5 + $0x18] sm:$0xff] (!%p4541_p10) }
 0x2a3   : > { %v4846_v38 = vpop.f32.mrb[24].mxu0 }
 0x2a4   : > { %v4868_v40 = vpop.f32.mrb[24].mxu1  ;;  %v4847_v41 = vpop.f32.mrb[25].mxu0 }
 0x2a5   : > { %v4848_v43 = vadd.f32 %v4847_v41, %v4846_v38  ;;  %v4869_v2 = vpop.f32.mrb[25].mxu1  ;;  %v4849_v42 = vpop.f32.mrb[26].mxu0  ;;  %v3571_v38 = vld [vmem:[%s6159_s5 + $0x88] sm:$0xff] (!%p4541_p10)  ;;  %v4550_v41 = vcombine.low (!%p4541_p10), %v3562_v19, %v3566_v47 }
 0x2a6   : > { %v4870_v31 = vadd.f32 %v4869_v2, %v4868_v40  ;;  %v4871_v48 = vpop.f32.mrb[26].mxu1  ;;  %v4850_v32 = vpop.f32.mrb[27].mxu0  ;;  %v3575_v40 = vld [vmem:[%s6159_s5 + $0xa8] sm:$0xff] (!%p4541_p10) }
 0x2a7   : > { %v3338_v23 = vadd.f32 %v4848_v43, %v3298_v39  ;;  %v4872_v33 = vpop.f32.mrb[27].mxu1  ;;  %v3574_v39 = vld [vmem:[%s6159_s5 + $0xa0] sm:$0xff] (!%p4541_p10)  ;;  %v4552_v43 = vcombine.low (!%p4541_p10), %v3563_v30, %v3567_v36  ;;  %v4561_v42 = vcombine.high (!%p4541_p10), %v3571_v38, %v3575_v40  ;;  %v3579_v32 = vld [vmem:[%s6159_s5 + $0xc8] sm:$0xff] (!%p4541_p10)  ;;  %3983 = vmatpush1.bf16.msra.mxu0 (!%p4541_p10), %v4550_v41  ;;  %v3556_v30 = vld [vmem:[%s6159_s5 + $0x10] sm:$0xff] (!%p4541_p10) }
 0x2a8   : > { %v4559_v2 = vcombine.high (!%p4541_p10), %v3570_v35, %v3574_v39  ;;  %v3582_v48 = vld [vmem:[%s6159_s5 + $0xe0] sm:$0xff] (!%p4541_p10)  ;;  %v4558_v33 = vcombine.low (!%p4541_p10), %v3570_v35, %v3574_v39  ;;  %v3560_v36 = vld [vmem:[%s6159_s5 + $0x30] sm:$0xff] (!%p4541_p10)  ;;  %v3561_v39 = vld [vmem:[%s6159_s5 + $0x38] sm:$0xff] (!%p4541_p10) }
 0x2a9   : > { %v3378_v49 = vadd.f32 %v4870_v31, %v3338_v23  ;;  %v3578_v31 = vld [vmem:[%s6159_s5 + $0xc0] sm:$0xff] (!%p4541_p10)  ;;  %v3583_v23 = vld [vmem:[%s6159_s5 + $0xe8] sm:$0xff] (!%p4541_p10)  ;;  %4024 = vmatpush1.bf16.msra.mxu1 (!%p4541_p10), %v4552_v43  ;;  %v4547_v41 = vcombine.high (!%p4541_p10), %v3556_v30, %v3560_v36  ;;  %v4549_v43 = vcombine.high (!%p4541_p10), %v3557_v63, %v3561_v39 }
 0x2aa   : > { %3984 = vmatprep.subr.bf16.mxu0 (!%p4541_p10), %v4559_v2  ;;  %4025 = vmatprep.subr.bf16.mxu1 (!%p4541_p10), %v4561_v42  ;;  %v3564_v2 = vld [vmem:[%s6159_s5 + $0x50] sm:$0xff] (!%p4541_p10) }
 0x2ab   : > { %3985 = vmatpush1.bf16.msra.mxu0 (!%p4541_p10), %v4558_v33  ;;  %v3568_v42 = vld [vmem:[%s6159_s5 + $0x70] sm:$0xff] (!%p4541_p10)  ;;  %v4548_v33 = vcombine.low (!%p4541_p10), %v3557_v63, %v3561_v39 }
 0x2ac   : > { %v3612_v63 = vld [vmem:[%s6159_s5 + $0x1d0] sm:$0xff] (!%p4541_p10) }
 0x2ad   : > { %v3616_v39 = vld [vmem:[%s6159_s5 + $0x1f0] sm:$0xff] (!%p4541_p10) }
 0x2c3   : > { %v4890_v34 = vpop.f32.mrb[28].mxu0 }
 0x2c4   : > { %v4912_v24 = vpop.f32.mrb[28].mxu1  ;;  %v4891_v52 = vpop.f32.mrb[29].mxu0 }
 0x2c5   : > { %v4892_v27 = vadd.f32 %v4891_v52, %v4890_v34  ;;  %v4913_v53 = vpop.f32.mrb[29].mxu1  ;;  %v4893_v28 = vpop.f32.mrb[30].mxu0  ;;  %v4567_v34 = vcombine.high (!%p4541_p10), %v3578_v31, %v3582_v48  ;;  %v3586_v52 = vld [vmem:[%s6159_s5 + $0x100] sm:$0xff] (!%p4541_p10) }
 0x2c6   : > { %v4914_v1 = vadd.f32 %v4913_v53, %v4912_v24  ;;  %v4915_v3 = vpop.f32.mrb[30].mxu1  ;;  %v4894_v50 = vpop.f32.mrb[31].mxu0  ;;  %v4569_v24 = vcombine.high (!%p4541_p10), %v3579_v32, %v3583_v23  ;;  %v3587_v53 = vld [vmem:[%s6159_s5 + $0x108] sm:$0xff] (!%p4541_p10) }
 0x2c7   : > { %v3418_v57 = vadd.f32 %v4892_v27, %v3378_v49  ;;  %v4916_v5 = vpop.f32.mrb[31].mxu1  ;;  %v4560_v49 = vcombine.low (!%p4541_p10), %v3571_v38, %v3575_v40  ;;  %v3590_v27 = vld [vmem:[%s6159_s5 + $0x120] sm:$0xff] (!%p4541_p10)  ;;  %v3591_v28 = vld [vmem:[%s6159_s5 + $0x128] sm:$0xff] (!%p4541_p10)  ;;  %3986 = vmatprep.subr.bf16.mxu0 (!%p4541_p10), %v4567_v34  ;;  %v4568_v3 = vcombine.low (!%p4541_p10), %v3579_v32, %v3583_v23  ;;  %v4598_v38 = vcombine.low (!%p4541_p10), %v3610_v17, %v3614_v45  ;;  %v3569_v32 = vld [vmem:[%s6159_s5 + $0x78] sm:$0xff] (!%p4541_p10) }
 0x2c8   : > { %v4575_v50 = vcombine.high (!%p4541_p10), %v3586_v52, %v3590_v27  ;;  %v3594_v5 = vld [vmem:[%s6159_s5 + $0x140] sm:$0xff] (!%p4541_p10)  ;;  %v4600_v40 = vcombine.low (!%p4541_p10), %v3611_v18, %v3615_v46  ;;  %v4546_v23 = vcombine.low (!%p4541_p10), %v3556_v30, %v3560_v36 }
 0x2c9   : > { %v3458_v51 = vadd.f32 %v4914_v1, %v3418_v57  ;;  %v4566_v1 = vcombine.low (!%p4541_p10), %v3578_v31, %v3582_v48  ;;  %4026 = vmatpush1.bf16.msra.mxu1 (!%p4541_p10), %v4560_v49  ;;  %v4577_v57 = vcombine.high (!%p4541_p10), %v3587_v53, %v3591_v28  ;;  %v3565_v48 = vld [vmem:[%s6159_s5 + $0x58] sm:$0xff] (!%p4541_p10)  ;;  %v4555_v49 = vcombine.high (!%p4541_p10), %v3564_v2, %v3568_v42 }
 0x2ca   : > { %4027 = vmatprep.subr.bf16.mxu1 (!%p4541_p10), %v4569_v24  ;;  %v4557_v34 = vcombine.high (!%p4541_p10), %v3565_v48, %v3569_v32  ;;  %v3572_v24 = vld [vmem:[%s6159_s5 + $0x90] sm:$0xff] (!%p4541_p10) }
 0x2cb   : > { %3987 = vmatpush1.bf16.msra.mxu0 (!%p4541_p10), %v4566_v1  ;;  %v4556_v1 = vcombine.low (!%p4541_p10), %v3565_v48, %v3569_v32  ;;  %v4602_v48 = vcombine.low (!%p4541_p10), %v3612_v63, %v3616_v39 }
 0x2cc   : > { %3988 = vmatprep.subr.bf16.mxu0 (!%p4541_p10), %v4575_v50 }
 0x2cd   : > { %4028 = vmatpush1.bf16.msra.mxu1 (!%p4541_p10), %v4568_v3 }
 0x2ce   : > { %4029 = vmatprep.subr.bf16.mxu1 (!%p4541_p10), %v4577_v57  ;;  %v3580_v57 = vld [vmem:[%s6159_s5 + $0xd0] sm:$0xff] (!%p4541_p10) }
 0x2e3   : > { %v4934_v0 = vpop.f32.mrb[32].mxu0 }
 0x2e4   : > { %v4956_v6 = vpop.f32.mrb[32].mxu1  ;;  %v4935_v55 = vpop.f32.mrb[33].mxu0 }
 0x2e5   : > { %v4936_v7 = vadd.f32 %v4935_v55, %v4934_v0  ;;  %v4957_v56 = vpop.f32.mrb[33].mxu1  ;;  %v4937_v8 = vpop.f32.mrb[34].mxu0  ;;  %v3595_v0 = vld [vmem:[%s6159_s5 + $0x148] sm:$0xff] (!%p4541_p10)  ;;  %v4574_v55 = vcombine.low (!%p4541_p10), %v3586_v52, %v3590_v27  ;;  %v3576_v52 = vld [vmem:[%s6159_s5 + $0xb0] sm:$0xff] (!%p4541_p10)  ;;  %v3573_v27 = vld [vmem:[%s6159_s5 + $0x98] sm:$0xff] (!%p4541_p10) }
 0x2e6   : > { %v4958_v4 = vadd.f32 %v4957_v56, %v4956_v6  ;;  %v4959_v9 = vpop.f32.mrb[34].mxu1  ;;  %v4938_v10 = vpop.f32.mrb[35].mxu0  ;;  %v3599_v6 = vld [vmem:[%s6159_s5 + $0x168] sm:$0xff] (!%p4541_p10)  ;;  %v4563_v3 = vcombine.high (!%p4541_p10), %v3572_v24, %v3576_v52 }
 0x2e7   : > { %v3498_v11 = vadd.f32 %v4936_v7, %v3458_v51  ;;  %v4960_v12 = vpop.f32.mrb[35].mxu1  ;;  %3548 = sbr.rel (%p4541_p10) target bundleno = 1021 (0x3fd), region = 79  ;;  %v3598_v51 = vld [vmem:[%s6159_s5 + $0x160] sm:$0xff] (!%p4541_p10)  ;;  %v4576_v7 = vcombine.low (!%p4541_p10), %v3587_v53, %v3591_v28  ;;  %v4585_v8 = vcombine.high (!%p4541_p10), %v3595_v0, %v3599_v6  ;;  %v3603_v10 = vld [vmem:[%s6159_s5 + $0x188] sm:$0xff] (!%p4541_p10)  ;;  %3989 = vmatpush1.bf16.msra.mxu0 (!%p4541_p10), %v4574_v55  ;;  %v3577_v53 = vld [vmem:[%s6159_s5 + $0xb8] sm:$0xff] (!%p4541_p10)  ;;  %v4554_v28 = vcombine.low (!%p4541_p10), %v3564_v2, %v3568_v42 }
 0x2e8   : > { %v4583_v56 = vcombine.high (!%p4541_p10), %v3594_v5, %v3598_v51  ;;  %v3606_v9 = vld [vmem:[%s6159_s5 + $0x1a0] sm:$0xff] (!%p4541_p10)  ;;  %v4582_v12 = vcombine.low (!%p4541_p10), %v3594_v5, %v3598_v51  ;;  %v4565_v50 = vcombine.high (!%p4541_p10), %v3573_v27, %v3577_v53  ;;  %v3584_v5 = vld [vmem:[%s6159_s5 + $0xf0] sm:$0xff] (!%p4541_p10)  ;;  %v3581_v51 = vld [vmem:[%s6159_s5 + $0xd8] sm:$0xff] (!%p4541_p10)  ;;  %v4564_v55 = vcombine.low (!%p4541_p10), %v3573_v27, %v3577_v53 }
 0x2e9   : > { %v3538_v14 = vadd.f32 %v4958_v4, %v3498_v11  ;;  %v3602_v4 = vld [vmem:[%s6159_s5 + $0x180] sm:$0xff] (!%p4541_p10)  ;;  %v3607_v11 = vld [vmem:[%s6159_s5 + $0x1a8] sm:$0xff] (!%p4541_p10)  ;;  %4030 = vmatpush1.bf16.msra.mxu1 (!%p4541_p10), %v4576_v7  ;;  %v4571_v7 = vcombine.high (!%p4541_p10), %v3580_v57, %v3584_v5  ;;  %v4603_v2 = vcombine.high (!%p4541_p10), %v3612_v63, %v3616_v39 }
 0x2ea   : > { %3990 = vmatprep.subr.bf16.mxu0 (!%p4541_p10), %v4583_v56  ;;  %v4591_v16 = vcombine.high (!%p4541_p10), %v3602_v4, %v3606_v9  ;;  %4031 = vmatprep.subr.bf16.mxu1 (!%p4541_p10), %v4585_v8  ;;  %v4593_v44 = vcombine.high (!%p4541_p10), %v3603_v10, %v3607_v11  ;;  %v4590_v47 = vcombine.low (!%p4541_p10), %v3602_v4, %v3606_v9  ;;  %v3588_v8 = vld [vmem:[%s6159_s5 + $0x110] sm:$0xff] (!%p4541_p10)  ;;  %v3593_v9 = vld [vmem:[%s6159_s5 + $0x138] sm:$0xff] (!%p4541_p10) }
 0x2eb   : > { %v3543_v15 = vadd.f32 %v3538_v14, %v854_v13  ;;  %v3550_v14 = vld [vmem:[%s6158_s4] sm:$0x1] (!%p4541_p10)  ;;  %3991 = vmatpush1.bf16.msra.mxu0 (!%p4541_p10), %v4582_v12  ;;  %v4592_v25 = vcombine.low (!%p4541_p10), %v3603_v10, %v3607_v11  ;;  %v3592_v4 = vld [vmem:[%s6159_s5 + $0x130] sm:$0xff] (!%p4541_p10)  ;;  %v4570_v10 = vcombine.low (!%p4541_p10), %v3580_v57, %v3584_v5 }
 0x2ec   : > { %3992 = vmatprep.subr.bf16.mxu0 (!%p4541_p10), %v4591_v16  ;;  %v4579_v12 = vcombine.high (!%p4541_p10), %v3588_v8, %v3592_v4  ;;  %v3597_v16 = vld [vmem:[%s6159_s5 + $0x158] sm:$0xff] (!%p4541_p10)  ;;  %v4578_v17 = vcombine.low (!%p4541_p10), %v3588_v8, %v3592_v4 }
 0x2ed   : > { %3544 = vst [vmem:[#allocation2] sm:$0x1] %v3543_v15  ;;  %v4584_v15 = vcombine.low (!%p4541_p10), %v3595_v0, %v3599_v6  ;;  %v3585_v0 = vld [vmem:[%s6159_s5 + $0xf8] sm:$0xff] (!%p4541_p10)  ;;  %v4562_v6 = vcombine.low (!%p4541_p10), %v3572_v24, %v3576_v52 }
 0x2ee   : > { %v4573_v56 = vcombine.high %v3581_v51, %v3585_v0  ;;  %v4572_v11 = vcombine.low %v3581_v51, %v3585_v0 }
 0x2ef   : > { %4032 = vmatpush1.bf16.msra.mxu1 %v4584_v15  ;;  %3993 = vmatpush1.bf16.msra.mxu0 %v4590_v47  ;;  %v3600_v15 = vld [vmem:[%s6159_s5 + $0x170] sm:$0xff] }
 0x2f0   : > { %4033 = vmatprep.subr.bf16.mxu1 %v4593_v44  ;;  %3994 = vmatprep.subr.bf16.mxu0 %v4599_v26  ;;  %v3601_v44 = vld [vmem:[%s6159_s5 + $0x178] sm:$0xff]  ;;  %v3608_v47 = vld [vmem:[%s6159_s5 + $0x1b0] sm:$0xff] }
 0x2f1   : > { %v4589_v46 = vcombine.high %v3597_v16, %v3601_v44  ;;  %v3609_v26 = vld [vmem:[%s6159_s5 + $0x1b8] sm:$0xff]  ;;  %v4588_v30 = vcombine.low %v3597_v16, %v3601_v44 }
 0x2f3   : > { %4034 = vmatpush1.bf16.msra.mxu1 %v4592_v25  ;;  %3995 = vmatpush1.bf16.msra.mxu0 %v4598_v38  ;;  %v3605_v25 = vld [vmem:[%s6159_s5 + $0x198] sm:$0xff] }
 0x2f4   : > { %v3549_v13 = vld [vmem:[#allocation2] sm:$0x1]  ;;  %4035 = vmatprep.subr.bf16.mxu1 %v4601_v29  ;;  %4062 = vmatprep.subr.bf16.mxu0 %v4547_v41  ;;  %v3613_v38 = vld [vmem:[%s6159_s5 + $0x1d8] sm:$0xff] }
 0x2f5   : > { %v3551_v19 = vadd.f32 %v3550_v14, %v3549_v13  ;;  %v3596_v14 = vld [vmem:[%s6159_s5 + $0x150] sm:$0xff] }
 0x2f6   : > { %v4587_v18 = vcombine.high %v3596_v14, %v3600_v15  ;;  %v4586_v29 = vcombine.low %v3596_v14, %v3600_v15 }
 0x2f7   : > { %v3552_v35 = vmax.f32 %v3551_v19, 0.0  ;;  %4036 = vmatpush1.bf16.msra.mxu1 %v4600_v40  ;;  %v3604_v19 = vld [vmem:[%s6159_s5 + $0x190] sm:$0xff]  ;;  %v3617_v40 = vld [vmem:[%s6159_s5 + $0x1f8] sm:$0xff] }
 0x2f8   : > { %4103 = vmatprep.subr.bf16.mxu1 %v4549_v43  ;;  %v4595_v36 = vcombine.high %v3604_v19, %v3608_v47  ;;  %v4594_v41 = vcombine.low %v3604_v19, %v3608_v47  ;;  %v4596_v43 = vcombine.low %v3605_v25, %v3609_v26  ;;  %v4605_v42 = vcombine.high %v3613_v38, %v3617_v40 }
 0x2f9   : > { %v6043_v31 = vpack.c.bf16 %v3552_v35, %v3552_v35  ;;  %v4597_v35 = vcombine.high %v3605_v25, %v3609_v26  ;;  %v4604_v32 = vcombine.low %v3613_v38, %v3617_v40 }
 0x2fb   : > { %4013 = vmatmul.mubr.bf16.vlgmr.msra.gmra.mrb[0].mxu0 %v6043_v31  ;;  %4054 = vmatmul.mubr.bf16.vlgmr.msra.gmra.mrb[0].mxu1 %v6043_v31 }
 0x2fc   : > { %4063 = vmatpush1.bf16.msra.mxu0 %v4546_v23  ;;  %4104 = vmatpush1.bf16.msra.mxu1 %v4548_v33  ;;  %v3618_v23 = vld [vmem:[%s6160_s6] sm:$0xff]  ;;  %v5315_v33 = vmov 1966171168  }
 0x2fd   : > { %4064 = vmatprep.subr.bf16.mxu0 %v4555_v49  ;;  %4105 = vmatprep.subr.bf16.mxu1 %v4557_v34  ;;  %v4157_v49 = vunpack.c.l.s4 %v5315_v33  ;;  %v3943_v34 = vrot.slane %v3618_v23, %v5534_v59  ;;  %v3951_v24 = vrot.slane %v3618_v23, %v5537_v60  ;;  %v3947_v52 = vrot.slane %v3618_v23, %v5528_v54 }
 0x2fe   : > { %4094 = vmatprep.mubr.bf16.mxu0 %v5314_v21  ;;  %4135 = vmatprep.mubr.bf16.mxu1 %v5314_v21  ;;  %v3589_v21 = vld [vmem:[%s6159_s5 + $0x118] sm:$0xff]  ;;  %v3955_v53 = vrot.slane %v3618_v23, %v5531_v58  ;;  %v3959_v58 = vrot.slane %v3618_v23, %v5568_v20 }
 0x2ff   : > { %v4581_v13 = vcombine.high %v3589_v21, %v3593_v9  ;;  %v4580_v45 = vcombine.low %v3589_v21, %v3593_v9  ;;  %v4158_v27 = vunpack.c.0.s8 %v4157_v49  ;;  %v3967_v21 = vrot.slane %v3618_v23, %v5571_v22 }
 0x300   : > { %4065 = vmatpush1.bf16.msra.mxu0 %v4554_v28  ;;  %4106 = vmatpush1.bf16.msra.mxu1 %v4556_v1  ;;  %v3963_v9 = vrot.slane %v3618_v23, %v5540_v61 }
 0x301   : > { %4066 = vmatprep.subr.bf16.mxu0 %v4563_v3  ;;  %4107 = vmatprep.subr.bf16.mxu1 %v4565_v50  ;;  %v4161_v5 = vsub.s32 %v4158_v27, %v5524_v37 }
 0x304   : > { %4067 = vmatpush1.bf16.msra.mxu0 %v4562_v6  ;;  %4108 = vmatpush1.bf16.msra.mxu1 %v4564_v55 }
 0x305   : > { %4068 = vmatprep.subr.bf16.mxu0 %v4571_v7  ;;  %4109 = vmatprep.subr.bf16.mxu1 %v4573_v56 }
 0x308   : > { %4069 = vmatpush1.bf16.msra.mxu0 %v4570_v10  ;;  %4110 = vmatpush1.bf16.msra.mxu1 %v4572_v11  ;;  %v3971_v10 = vrot.slane %v3618_v23, %v5543_v62 }
 0x309   : > { %4070 = vmatprep.subr.bf16.mxu0 %v4579_v12  ;;  %4111 = vmatprep.subr.bf16.mxu1 %v4581_v13 }
 0x30c   : > { %4071 = vmatpush1.bf16.msra.mxu0 %v4578_v17  ;;  %4112 = vmatpush1.bf16.msra.mxu1 %v4580_v45 }
 0x30d   : > { %4072 = vmatprep.subr.bf16.mxu0 %v4587_v18  ;;  %4113 = vmatprep.subr.bf16.mxu1 %v4589_v46 }
 0x310   : > { %4073 = vmatpush1.bf16.msra.mxu0 %v4586_v29  ;;  %4114 = vmatpush1.bf16.msra.mxu1 %v4588_v30 }
 0x311   : > { %4074 = vmatprep.subr.bf16.mxu0 %v4595_v36  ;;  %4115 = vmatprep.subr.bf16.mxu1 %v4597_v35 }
 0x314   : > { %4075 = vmatpush1.bf16.msra.mxu0 %v4594_v41  ;;  %4116 = vmatpush1.bf16.msra.mxu1 %v4596_v43 }
 0x315   : > { %4076 = vmatprep.subr.bf16.mxu0 %v4603_v2  ;;  %4117 = vmatprep.subr.bf16.mxu1 %v4605_v42 }
 0x318   : > { %4077 = vmatpush1.bf16.msra.mxu0 %v4602_v48  ;;  %4118 = vmatpush1.bf16.msra.mxu1 %v4604_v32 }
 0x31b   : > { %4095 = vmatmul.mubr.bf16.vlgmr.msra.gmra.mrb[4].mxu0 %v6043_v31  ;;  %4136 = vmatmul.mubr.bf16.vlgmr.msra.gmra.mrb[4].mxu1 %v6043_v31 }
 0x3ce   : > { %v4014_v28 = vpop.f32.mrb[0].mxu0  ;;  %v4055_v3 = vpop.f32.mrb[0].mxu1 }
 0x3cf   : > { %v4015_v1 = vadd.f32 %v4014_v28, %v3943_v34  ;;  %v4016_v50 = vpop.f32.mrb[1].mxu0  ;;  %v4056_v31 = vadd.f32 %v4055_v3, %v3951_v24  ;;  %v4057_v51 = vpop.f32.mrb[1].mxu1 }
 0x3d0   : > { %v4017_v57 = vadd.f32 %v4016_v50, %v3947_v52  ;;  %v4018_v0 = vpop.f32.mrb[2].mxu0  ;;  %v4058_v6 = vadd.f32 %v4057_v51, %v3955_v53  ;;  %v4059_v55 = vpop.f32.mrb[2].mxu1 }
 0x3d1   : > { %v4019_v59 = vpop.f32.mrb[3].mxu0  ;;  %v4060_v60 = vpop.f32.mrb[3].mxu1 }
 0x3d2   : > { %v4152_v7 = vcombine.low %v4015_v1, %v4017_v57  ;;  %v4153_v56 = vcombine.low %v4056_v31, %v4058_v6 }
 0x3d4   : > { %v4162_v54 = vrot.slane %v4152_v7, %v4161_v5  ;;  %v4169_v8 = vrot.slane %v4153_v56, %v4161_v5 }
 0x3d6   : > { %v4184_v4 = vcombine.low %v4162_v54, %v4169_v8 }
 0x3d8   : > { %v4192_v61 = vrot.slane %v4184_v4, %v4161_v5 }
 0x3ee   : > { %v4096_v37 = vpop.f32.mrb[4].mxu0  ;;  %v4137_v12 = vpop.f32.mrb[4].mxu1 }
 0x3ef   : > { %v4097_v11 = vadd.f32 %v4096_v37, %v3959_v58  ;;  %v4098_v13 = vpop.f32.mrb[5].mxu0  ;;  %v4138_v14 = vadd.f32 %v4137_v12, %v3967_v21  ;;  %v4139_v16 = vpop.f32.mrb[5].mxu1 }
 0x3f0   : > { %v4099_v15 = vadd.f32 %v4098_v13, %v3963_v9  ;;  %v4100_v44 = vpop.f32.mrb[6].mxu0  ;;  %v4140_v17 = vadd.f32 %v4139_v16, %v3971_v10  ;;  %v4141_v45 = vpop.f32.mrb[6].mxu1 }
 0x3f1   : > { %v4101_v18 = vpop.f32.mrb[7].mxu0  ;;  %v4142_v19 = vpop.f32.mrb[7].mxu1 }
 0x3f2   : > { %v4154_v46 = vcombine.low %v4097_v11, %v4099_v15  ;;  %v4155_v20 = vcombine.low %v4138_v14, %v4140_v17 }
 0x3f4   : > { %v4176_v47 = vrot.slane %v4154_v46, %v4161_v5  ;;  %v4183_v22 = vrot.slane %v4155_v20, %v4161_v5 }
 0x3f6   : > { %v4185_v25 = vcombine.low %v4176_v47, %v4183_v22 }
 0x3f8   : > { %v4199_v26 = vrot.slane %v4185_v25, %v4161_v5 }
 0x3fa   : > { %v4200_v62 = vcombine.low %v4192_v61, %v4199_v26 }
 0x3fc   : > { %4202 = vst [vmem:[%s6161_s7] sm:$0xff] %v4200_v62 }
 0x3fd PF: > { %p14_p11 = scmp.ge.s32.totalorder %s5375_s28, 4   ;;  %s6162_s24 = smov %s5305_s25 }
 0x3fe   : > { %s6163_s25 = smov %s5384_s8  ;;  %s6164_s26 = smov %s5375_s28 }
 0x3ff   :  { %16 = sbr.rel (!%p14_p11) target bundleno = 2 (0x2), region = 113 }

</bundles_post_ra>
